<compile_context>
chip_gen: v6e
topology: v6e:2x2x1
jax: 0.10.0
libtpu: 0.0.40
codegen_flags: <defaults>
</compile_context>

<pallas_src>
import math
import jax
import jax.numpy as jnp
from jax.experimental import pallas as pl
from jax.experimental.pallas import tpu as pltpu

LN_EPS = 1e-5  # torch.nn.LayerNorm default


def _layernorm(h, gamma, beta):
    mean = jnp.mean(h, axis=-1, keepdims=True)
    var = jnp.mean((h - mean) ** 2, axis=-1, keepdims=True)   # biased, like torch
    return (h - mean) * jax.lax.rsqrt(var + LN_EPS) * gamma + beta


# ------------------------------ kernel ---------------------------------------
def encoder_stack_kernel(x_ref, wqkv_ref, wo_ref, w1_ref, w2_ref,
                         b1_ref, vecd_ref, o_ref, act_ref):
    layer = pl.program_id(1)
    n_layers = pl.num_programs(1)
    Bb, T, D = x_ref.shape
    HD3 = wqkv_ref.shape[-1]
    HD = HD3 // 3
    cdt = wqkv_ref.dtype           # MXU input dtype (bf16 weights => bf16 matmuls)

    # Layer 0: pull this batch block into the resident f32 activation scratch.
    @pl.when(layer == 0)
    def _():
        act_ref[...] = x_ref[...].reshape(Bb * T, D).astype(jnp.float32)

    x = act_ref[...]                                  # (Bb*T, D) f32 residual stream
    xc = x.astype(cdt)

    vecs = vecd_ref[0]                                # (6, D) f32 coalesced per-layer vectors
    bo, b2 = vecs[0:1], vecs[1:2]                     # b2 is pre-doubled (prepare_params)
    g1, be1 = vecs[2:3], vecs[3:4]
    g2, be2 = vecs[4:5], vecs[5:6]

    # ---- attention: fused QKV projection (one MXU matmul, N = 3*HD) ---------
    # The 1/sqrt(HD) logit scale is folded into the q columns of wqkv (host-side).
    qkv = jnp.dot(xc, wqkv_ref[0], preferred_element_type=jnp.float32)   # (Bb*T, 3HD)
    q = qkv[:, :HD].reshape(Bb, T, HD).astype(cdt)
    k = qkv[:, HD:2 * HD].reshape(Bb, T, HD).astype(cdt)
    v = qkv[:, 2 * HD:].reshape(Bb, T, HD).astype(cdt)

    # batched q @ k^T: contract last dims directly (no transposed copy of k)
    logits = jnp.einsum("bqd,bkd->bqk", q, k, preferred_element_type=jnp.float32)
    # TODO(synk): optional attention mask (mask is None in the Encoder forward path)
    logits = logits - jnp.max(logits, axis=-1, keepdims=True)
    p = jnp.exp(logits)
    denom = jnp.sum(p, axis=-1, keepdims=True)
    r = pl.reciprocal(denom, approx=True)             # EUP slot
    r = r * (2.0 - denom * r)                         # one Newton step -> ~exact
    attn = p * r
    values = jnp.einsum("bqk,bkd->bqd", attn.astype(cdt), v,
                        preferred_element_type=jnp.float32)              # (Bb, T, HD)
    attn_out = jnp.dot(values.reshape(Bb * T, HD).astype(cdt), wo_ref[0],
                       preferred_element_type=jnp.float32) + bo          # (Bb*T, D)

    # ---- residual + norm1 (f32) ----------------------------------------------
    h = _layernorm(x + attn_out, g1, be1)

    # ---- MLP: Linear -> Dropout(p=0) -> ReLU -> Linear ------------------------
    m = jnp.dot(h.astype(cdt), w1_ref[0], preferred_element_type=jnp.float32) + b1_ref[0]
    m = jnp.maximum(m, 0.0)
    # Reference quirk (`x = self.mlp(x); x = x + self.dropout(x)` with p=0 doubles
    # the MLP output, dropping the pre-MLP residual) is folded into the
    # pre-doubled w2/b2 (see prepare_params).
    m = jnp.dot(m.astype(cdt), w2_ref[0], preferred_element_type=jnp.float32) + b2

    out = _layernorm(m, g2, be2)
    act_ref[...] = out                                # carry to next layer (stays in VMEM)

    @pl.when(layer == n_layers - 1)
    def _():
        o_ref[...] = out.reshape(Bb, T, D).astype(o_ref.dtype)


# ------------------------------ sizing helpers --------------------------------
def _vmem_capacity_bytes():
    try:
        return int(pltpu.get_tpu_info().vmem_capacity_bytes)
    except Exception:
        return 128 << 20   # v5e/v6e default


def _vmem_footprint(Bb, T, D, HD, F, adt, wdt, nbuf_w):
    """Conservative per-grid-step VMEM estimate, incl. the big f32 temporaries."""
    rows = Bb * T
    act_io = 2 * (2 * rows * D * adt)                        # x + out blocks, double-buffered
    weights = nbuf_w * (D * 3 * HD + HD * D + D * F + F * D) * wdt
    small = 2 * (F + 6 * D) * 4                              # b1 + coalesced vector bundle
    scratch = rows * D * 4                                   # resident f32 activation
    tmps = (rows * 3 * HD * (4 + wdt)                        # qkv f32 + q/k/v in matmul dtype
            + 3 * Bb * T * T * 4                             # logits, p, attn
            + rows * HD * 4                                  # values
            + 3 * rows * D * 4                               # attn_out, h, out
            + rows * F * 4)                                  # MLP hidden
    return act_io + weights + small + scratch + tmps


def _pick_block_b(B, T, D, HD, F, adt, wdt, budget, min_blocks, nbuf_w=2):
    """Largest divisor of B whose VMEM footprint fits `budget`, with >= min_blocks blocks."""
    divisors = sorted((d for d in range(1, B + 1) if B % d == 0), reverse=True)
    for d in divisors:
        if B // d >= min_blocks and _vmem_footprint(d, T, D, HD, F, adt, wdt, nbuf_w) <= budget:
            return d
    for d in divisors:                                       # relax the min_blocks constraint
        if _vmem_footprint(d, T, D, HD, F, adt, wdt, nbuf_w) <= budget:
            return d
    return 1


# ------------------------------ host-side weight prep -------------------------
def prepare_params(params, *, matmul_dtype=None):
    """One-time host-side weight transform (call once, outside the hot path):
      * fold the 1/sqrt(num_heads*embed_dim) logit scale into the q columns of wqkv
      * fold the `x = mlp(x); x = x + dropout(x)` doubling into w2 / b2
      * coalesce the six per-layer D-sized vectors into one (L, 6, D) array
      * optionally cast the four matmul weight matrices (bf16 recommended:
        halves re-streamed HBM bytes, ~2x MXU throughput; f32 accumulate in-kernel).
    """
    f32 = lambda a: jnp.asarray(a, jnp.float32)
    wqkv = f32(params["wqkv"])
    L, D, HD3 = wqkv.shape
    HD = HD3 // 3
    scale = jnp.concatenate([jnp.full((HD,), 1.0 / math.sqrt(HD), jnp.float32),
                             jnp.ones((2 * HD,), jnp.float32)])
    wqkv = wqkv * scale[None, None, :]
    w2 = 2.0 * f32(params["w2"])
    b2 = 2.0 * f32(params["b2"])

    mdt = matmul_dtype if matmul_dtype is not None else params["wqkv"].dtype
    vecd = jnp.stack([f32(params["bo"])[:, 0, :],
                      b2[:, 0, :],
                      f32(params["g1"])[:, 0, :],
                      f32(params["be1"])[:, 0, :],
                      f32(params["g2"])[:, 0, :],
                      f32(params["be2"])[:, 0, :]], axis=1)          # (L, 6, D)
    return {
        "wqkv": wqkv.astype(mdt),             # q columns pre-scaled by 1/sqrt(HD)
        "wo":   f32(params["wo"]).astype(mdt),
        "w1":   f32(params["w1"]).astype(mdt),
        "w2":   w2.astype(mdt),               # pre-doubled
        "b1":   f32(params["b1"]),            # (L, 1, F)
        "vecd": vecd,                         # (L, 6, D): bo, 2*b2, g1, be1, g2, be2
    }


# ------------------------------ wrapper ---------------------------------------
def transformer_encoder(x, prepared, *, block_b=None):
    B, T, D = x.shape
    L, _, HD3 = prepared["wqkv"].shape
    HD = HD3 // 3
    F = prepared["w1"].shape[-1]

    # Alignment contract: keeps the (Bb,T,D)<->(Bb*T,D) reshapes and the q|k|v
    # lane slices free of XLU retile copies.
    assert T % 8 == 0, "T must be a multiple of 8 (pad the sequence)"
    assert D % 128 == 0 and HD % 128 == 0 and F % 128 == 0, \
        "D, num_heads*D and dim_feedforward must be multiples of 128"

    adt = jnp.dtype(x.dtype).itemsize
    wdt = jnp.dtype(prepared["wqkv"].dtype).itemsize

    # Generation-aware VMEM budget: leave headroom for compiler-internal scratch
    # and DMA bookkeeping (~50 MiB usable on v7x, ~100 MiB on v5e/v6e).
    vmem_cap = _vmem_capacity_bytes()
    budget = vmem_cap - max(12 << 20, vmem_cap // 5)
    # v7x (64 MiB/TC, 2 TCs): aim for exactly 2 batch blocks so the "parallel"
    # axis feeds both cores; v5e/v6e: 1 block => weight stack streamed once.
    min_blocks = 2 if vmem_cap <= (64 << 20) else 1

    Bb = _pick_block_b(B, T, D, HD, F, adt, wdt, budget, min_blocks) \
        if block_b is None else block_b
    assert B % Bb == 0, "block_b must divide the batch"
    n_blocks = B // Bb

    # Deeper weight prefetch only on 128-MiB chips, only if it still fits.
    nbuf_w = 2
    if L >= 3 and vmem_cap > (64 << 20) and \
            _vmem_footprint(Bb, T, D, HD, F, adt, wdt, 3) <= budget:
        nbuf_w = 3

    act_map = lambda b, l: (b, 0, 0)       # activations: indexed by batch block only
    wt_map = lambda b, l: (l, 0, 0)        # weights: indexed by layer only

    def wspec(shape):
        if nbuf_w == 2:
            return pl.BlockSpec(shape, wt_map)
        return pl.BlockSpec(shape, wt_map, pipeline_mode=pl.Buffered(nbuf_w))

    # TODO(synk): for large D/F (per-layer weight bytes > ~budget/4) tile wqkv /
    # w1 / w2 along the 3HD and F axes (inner grid axis or pltpu.emit_pipeline)
    # instead of streaming each matrix whole.
    in_specs = [
        pl.BlockSpec((Bb, T, D), act_map),     # x
        wspec((1, D, HD3)),                    # wqkv (fused q|k|v, q pre-scaled)
        wspec((1, HD, D)),                     # wo
        wspec((1, D, F)),                      # w1
        wspec((1, F, D)),                      # w2 (pre-doubled)
        pl.BlockSpec((1, 1, F), wt_map),       # b1
        pl.BlockSpec((1, 6, D), wt_map),       # coalesced [bo, 2*b2, g1, be1, g2, be2]
    ]

    # Advisory cost so XLA schedules surrounding ops around this fused call.
    flops = 2 * L * B * T * (D * 3 * HD + 2 * T * HD + HD * D + 2 * D * F)
    bytes_accessed = (2 * B * T * D * adt
                      + n_blocks * L * ((D * 3 * HD + HD * D + 2 * D * F) * wdt
                                        + (F + 6 * D) * 4))
    cost = pl.CostEstimate(flops=flops, transcendentals=L * B * T * T,
                           bytes_accessed=bytes_accessed)

    grid_spec = pltpu.PrefetchScalarGridSpec(
        num_scalar_prefetch=0,
        grid=(n_blocks, L),                    # (batch blocks, layers)
        in_specs=in_specs,
        out_specs=pl.BlockSpec((Bb, T, D), act_map),
        scratch_shapes=[pltpu.VMEM((Bb * T, D), jnp.float32)],
    )
    return pl.pallas_call(
        encoder_stack_kernel,
        out_shape=jax.ShapeDtypeStruct((B, T, D), x.dtype),
        grid_spec=grid_spec,
        cost_estimate=cost,
        compiler_params=pltpu.CompilerParams(
            dimension_semantics=("parallel", "arbitrary"),
            vmem_limit_bytes=int(budget)),
    )(x, prepared["wqkv"], prepared["wo"], prepared["w1"], prepared["w2"],
      prepared["b1"], prepared["vecd"])


# ---------------- parameter init (deterministic, mirrors module __init__) -----
def _xavier_uniform(key, shape):
    fan_in, fan_out = shape
    bound = math.sqrt(6.0 / (fan_in + fan_out))
    return jax.random.uniform(key, shape, jnp.float32, -bound, bound)


def init_params(key, num_layers, input_dim, num_heads, dim_feedforward):
    D, F = input_dim, dim_feedforward
    HD = num_heads * D                      # embed_dim == input_dim inside Encoder
    layers = []
    for k in jax.random.split(key, num_layers):
        ks = jax.random.split(k, 6)
        layers.append({
            # qkv_proj: xavier_uniform weight, zero-filled bias (omitted).
            # TODO(synk): when importing torch weights, de-interleave the qkv
            # columns (reshape(...,HD,3).chunk) into contiguous [q|k|v] blocks.
            "wqkv": _xavier_uniform(ks[0], (D, 3 * HD)),
            "wo":   _xavier_uniform(ks[1], (HD, D)),    # o_proj, zero bias
            "bo":   jnp.zeros((1, D), jnp.float32),
            "w1":   _xavier_uniform(ks[2], (D, F)),
            "b1":   0.01 * jax.random.normal(ks[3], (1, F), jnp.float32),
            "w2":   _xavier_uniform(ks[4], (F, D)),
            "b2":   0.01 * jax.random.normal(ks[5], (1, D), jnp.float32),
            "g1":   jnp.ones((1, D), jnp.float32),
            "be1":  jnp.zeros((1, D), jnp.float32),
            "g2":   jnp.ones((1, D), jnp.float32),
            "be2":  jnp.zeros((1, D), jnp.float32),
        })
    return {k: jnp.stack([lay[k] for lay in layers], axis=0) for k in layers[0]}


# ---------------- pure-JAX reference for the correctness check ----------------
def _ref_layer(x, p):
    qkv = x @ p["wqkv"]
    HD = qkv.shape[-1] // 3
    q, k, v = qkv[..., :HD], qkv[..., HD:2 * HD], qkv[..., 2 * HD:]
    logits = jnp.einsum("bqd,bkd->bqk", q, k) / math.sqrt(HD)
    attn = jax.nn.softmax(logits, axis=-1)
    values = jnp.einsum("bqk,bkd->bqd", attn, v)
    attn_out = values @ p["wo"] + p["bo"][0]
    h = _layernorm(x + attn_out, p["g1"][0], p["be1"][0])
    m = jnp.maximum(h @ p["w1"] + p["b1"][0], 0.0) @ p["w2"] + p["b2"][0]
    m = m + m                               # reference quirk
    return _layernorm(m, p["g2"][0], p["be2"][0])


def ref_encoder(x, params):
    L = params["wqkv"].shape[0]
    for l in range(L):
        x = _ref_layer(x, {k: v[l] for k, v in params.items()})
    return x


if __name__ == "__main__":
    # Small shapes consistent with the module: x is (batch, seq, input_dim).
    # D=128 keeps every lane dim a multiple of 128 (lane-dense loads/stores).
    B, T, D = 4, 8, 128
    num_heads, dim_ff, num_layers = 2, 256, 2

    key = jax.random.PRNGKey(0)
    kx, kp = jax.random.split(key)
    x = jax.random.normal(kx, (B, T, D), jnp.float32)
    params = init_params(kp, num_layers, D, num_heads, dim_ff)
    ref = ref_encoder(x, params)

    # f32-weight path (exact-ish): check against the pure-JAX reference.
    prep_f32 = prepare_params(params)
    out = jax.block_until_ready(transformer_encoder(x, prep_f32))
    assert out.shape == (B, T, D)
    assert jnp.allclose(out, ref, atol=3e-2, rtol=3e-2), "mismatch vs JAX reference"

    # bf16-weight path (halves weight HBM traffic, ~2x MXU throughput;
    # f32 accumulation, f32 LayerNorm / softmax).
    prep_bf16 = prepare_params(params, matmul_dtype=jnp.bfloat16)
    outb = jax.block_until_ready(transformer_encoder(x, prep_bf16))
    assert outb.shape == (B, T, D)
    assert bool(jnp.all(jnp.isfinite(outb)))

    print("KERNEL_OK")
</pallas_src>

<mosaic_0001>
module attributes {stable_mosaic.version = 11 : i64} {
  func.func @encoder_stack_kernel(%arg0: i32, %arg1: i32, %arg2: memref<4x8x128xf32, #tpu.memory_space<vmem>>, %arg3: memref<1x128x768xf32, #tpu.memory_space<vmem>>, %arg4: memref<1x256x128xf32, #tpu.memory_space<vmem>>, %arg5: memref<1x128x256xf32, #tpu.memory_space<vmem>>, %arg6: memref<1x256x128xf32, #tpu.memory_space<vmem>>, %arg7: memref<1x1x256xf32, #tpu.memory_space<vmem>>, %arg8: memref<1x6x128xf32, #tpu.memory_space<vmem>>, %arg9: memref<4x8x128xf32, #tpu.memory_space<vmem>>, %arg10: memref<32x128xf32, #tpu.memory_space<vmem>>) attributes {dimension_semantics = [#tpu.dimension_semantics<parallel>, #tpu.dimension_semantics<arbitrary>], iteration_bounds = array<i64: 1, 2>, scalar_prefetch = 0 : i64, scratch_operands = 1 : i64, tpu.core_type = #tpu.core_type<tc>, window_params = [{transform_indices = @transform_0, window_bounds = array<i64: 4, 8, 128>}, {transform_indices = @transform_1, window_bounds = array<i64: 1, 128, 768>}, {transform_indices = @transform_2, window_bounds = array<i64: 1, 256, 128>}, {transform_indices = @transform_3, window_bounds = array<i64: 1, 128, 256>}, {transform_indices = @transform_4, window_bounds = array<i64: 1, 256, 128>}, {transform_indices = @transform_5, window_bounds = array<i64: 1, 1, 256>}, {transform_indices = @transform_6, window_bounds = array<i64: 1, 6, 128>}, {transform_indices = @transform_7, window_bounds = array<i64: 4, 8, 128>}]} {
    %c0_i32 = arith.constant 0 : i32
    %0 = arith.cmpi eq, %arg1, %c0_i32 : i32
    %1 = arith.extui %0 : i1 to i32
    %c0_i32_0 = arith.constant 0 : i32
    %2 = arith.cmpi ne, %1, %c0_i32_0 : i32
    scf.if %2 {
      %c0_42 = arith.constant 0 : index
      %c0_43 = arith.constant 0 : index
      %c0_44 = arith.constant 0 : index
      %106 = vector.load %arg2[%c0_42, %c0_43, %c0_44] : memref<4x8x128xf32, #tpu.memory_space<vmem>>, vector<4x8x128xf32>
      %107 = vector.shape_cast %106 : vector<4x8x128xf32> to vector<32x128xf32>
      %c0_45 = arith.constant 0 : index
      %c0_46 = arith.constant 0 : index
      %108 = vector.load %arg10[%c0_45, %c0_46] : memref<32x128xf32, #tpu.memory_space<vmem>>, vector<32x128xf32>
      tpu.vector_store %arg10[%c0_45, %c0_46], %107 {strides = array<i32>} : memref<32x128xf32, #tpu.memory_space<vmem>>, vector<32x128xf32>,
    } else {
    }
    %c0 = arith.constant 0 : index
    %c0_1 = arith.constant 0 : index
    %3 = vector.load %arg10[%c0, %c0_1] : memref<32x128xf32, #tpu.memory_space<vmem>>, vector<32x128xf32>
    %c0_2 = arith.constant 0 : index
    %c0_3 = arith.constant 0 : index
    %c0_4 = arith.constant 0 : index
    %4 = vector.load %arg8[%c0_2, %c0_3, %c0_4] : memref<1x6x128xf32, #tpu.memory_space<vmem>>, vector<1x6x128xf32>
    %5 = vector.shape_cast %4 : vector<1x6x128xf32> to vector<6x128xf32>
    %6 = vector.extract_strided_slice %5 {offsets = [0, 0], sizes = [1, 128], strides = [1, 1]} : vector<6x128xf32> to vector<1x128xf32>
    %7 = vector.extract_strided_slice %5 {offsets = [1, 0], sizes = [1, 128], strides = [1, 1]} : vector<6x128xf32> to vector<1x128xf32>
    %8 = vector.extract_strided_slice %5 {offsets = [2, 0], sizes = [1, 128], strides = [1, 1]} : vector<6x128xf32> to vector<1x128xf32>
    %9 = vector.extract_strided_slice %5 {offsets = [3, 0], sizes = [1, 128], strides = [1, 1]} : vector<6x128xf32> to vector<1x128xf32>
    %10 = vector.extract_strided_slice %5 {offsets = [4, 0], sizes = [1, 128], strides = [1, 1]} : vector<6x128xf32> to vector<1x128xf32>
    %11 = vector.extract_strided_slice %5 {offsets = [5, 0], sizes = [1, 128], strides = [1, 1]} : vector<6x128xf32> to vector<1x128xf32>
    %c0_5 = arith.constant 0 : index
    %c0_6 = arith.constant 0 : index
    %c0_7 = arith.constant 0 : index
    %12 = vector.load %arg3[%c0_5, %c0_6, %c0_7] : memref<1x128x768xf32, #tpu.memory_space<vmem>>, vector<1x128x768xf32>
    %13 = vector.shape_cast %12 : vector<1x128x768xf32> to vector<128x768xf32>
    %cst = arith.constant dense<0.000000e+00> : vector<32x768xf32>
    %14 = tpu.matmul %3, %13, %cst {dimension_numbers = #tpu.dot_dimension_numbers<[1], [0], [0], [1], [0, 0, 1, 1], [], []>} : vector<32x128xf32>, vector<128x768xf32>, vector<32x768xf32> -> vector<32x768xf32>
    %15 = vector.extract_strided_slice %14 {offsets = [0, 0], sizes = [32, 256], strides = [1, 1]} : vector<32x768xf32> to vector<32x256xf32>
    %16 = vector.shape_cast %15 : vector<32x256xf32> to vector<4x8x256xf32>
    %17 = vector.extract_strided_slice %14 {offsets = [0, 256], sizes = [32, 256], strides = [1, 1]} : vector<32x768xf32> to vector<32x256xf32>
    %18 = vector.shape_cast %17 : vector<32x256xf32> to vector<4x8x256xf32>
    %19 = vector.extract_strided_slice %14 {offsets = [0, 512], sizes = [32, 256], strides = [1, 1]} : vector<32x768xf32> to vector<32x256xf32>
    %20 = vector.shape_cast %19 : vector<32x256xf32> to vector<4x8x256xf32>
    "tpu.trace_start"() <{level = 10 : i32, message = "bqd,bkd->bqk"}> : () -> ()
    %cst_8 = arith.constant dense<0.000000e+00> : vector<4x8x8xf32>
    %21 = tpu.matmul %16, %18, %cst_8 {dimension_numbers = #tpu.dot_dimension_numbers<[2], [2], [1], [1], [0, 0, 0, 1, 1, 1], [0], [0]>} : vector<4x8x256xf32>, vector<4x8x256xf32>, vector<4x8x8xf32> -> vector<4x8x8xf32>
    "tpu.trace_stop"() : () -> ()
    %cst_9 = arith.constant dense<0xFF800000> : vector<4x8xf32>
    %22 = vector.multi_reduction <maximumf>, %21, %cst_9 [2] : vector<4x8x8xf32> to vector<4x8xf32>
    %23 = vector.shape_cast %22 : vector<4x8xf32> to vector<4x8x1xf32>
    %24 = vector.broadcast %23 : vector<4x8x1xf32> to vector<4x8x8xf32>
    %25 = arith.subf %21, %24 : vector<4x8x8xf32>
    %26 = math.exp %25 : vector<4x8x8xf32>
    %cst_10 = arith.constant dense<0.000000e+00> : vector<4x8xf32>
    %27 = vector.multi_reduction <add>, %26, %cst_10 [2] : vector<4x8x8xf32> to vector<4x8xf32>
    %28 = vector.shape_cast %27 : vector<4x8xf32> to vector<4x8x1xf32>
    %29 = tpu.reciprocal %28 {approx = true} : vector<4x8x1xf32> -> vector<4x8x1xf32>
    %30 = arith.mulf %28, %29 : vector<4x8x1xf32>
    %cst_11 = arith.constant 2.000000e+00 : f32
    %31 = vector.broadcast %cst_11 : f32 to vector<4x8x1xf32>
    %32 = arith.subf %31, %30 : vector<4x8x1xf32>
    %33 = arith.mulf %29, %32 : vector<4x8x1xf32>
    %34 = vector.broadcast %33 : vector<4x8x1xf32> to vector<4x8x8xf32>
    %35 = arith.mulf %26, %34 : vector<4x8x8xf32>
    "tpu.trace_start"() <{level = 10 : i32, message = "bqk,bkd->bqd"}> : () -> ()
    %cst_12 = arith.constant dense<0.000000e+00> : vector<4x8x256xf32>
    %36 = tpu.matmul %35, %20, %cst_12 {dimension_numbers = #tpu.dot_dimension_numbers<[2], [1], [1], [2], [0, 0, 0, 1, 1, 2], [0], [0]>} : vector<4x8x8xf32>, vector<4x8x256xf32>, vector<4x8x256xf32> -> vector<4x8x256xf32>
    "tpu.trace_stop"() : () -> ()
    %37 = vector.shape_cast %36 : vector<4x8x256xf32> to vector<32x256xf32>
    %c0_13 = arith.constant 0 : index
    %c0_14 = arith.constant 0 : index
    %c0_15 = arith.constant 0 : index
    %38 = vector.load %arg4[%c0_13, %c0_14, %c0_15] : memref<1x256x128xf32, #tpu.memory_space<vmem>>, vector<1x256x128xf32>
    %39 = vector.shape_cast %38 : vector<1x256x128xf32> to vector<256x128xf32>
    %cst_16 = arith.constant dense<0.000000e+00> : vector<32x128xf32>
    %40 = tpu.matmul %37, %39, %cst_16 {dimension_numbers = #tpu.dot_dimension_numbers<[1], [0], [0], [1], [0, 0, 1, 1], [], []>} : vector<32x256xf32>, vector<256x128xf32>, vector<32x128xf32> -> vector<32x128xf32>
    %41 = vector.broadcast %6 : vector<1x128xf32> to vector<32x128xf32>
    %42 = arith.addf %40, %41 : vector<32x128xf32>
    %43 = arith.addf %3, %42 : vector<32x128xf32>
    %cst_17 = arith.constant dense<0.000000e+00> : vector<32xf32>
    %44 = vector.multi_reduction <add>, %43, %cst_17 [1] : vector<32x128xf32> to vector<32xf32>
    %45 = vector.shape_cast %44 : vector<32xf32> to vector<32x1xf32>
    %cst_18 = arith.constant 1.280000e+02 : f32
    %46 = vector.broadcast %cst_18 : f32 to vector<32x1xf32>
    %47 = arith.divf %45, %46 : vector<32x1xf32>
    %48 = vector.broadcast %47 : vector<32x1xf32> to vector<32x128xf32>
    %49 = arith.subf %43, %48 : vector<32x128xf32>
    %50 = arith.mulf %49, %49 : vector<32x128xf32>
    %cst_19 = arith.constant dense<0.000000e+00> : vector<32xf32>
    %51 = vector.multi_reduction <add>, %50, %cst_19 [1] : vector<32x128xf32> to vector<32xf32>
    %52 = vector.shape_cast %51 : vector<32xf32> to vector<32x1xf32>
    %cst_20 = arith.constant 1.280000e+02 : f32
    %53 = vector.broadcast %cst_20 : f32 to vector<32x1xf32>
    %54 = arith.divf %52, %53 : vector<32x1xf32>
    %55 = vector.broadcast %47 : vector<32x1xf32> to vector<32x128xf32>
    %56 = arith.subf %43, %55 : vector<32x128xf32>
    %cst_21 = arith.constant 9.99999974E-6 : f32
    %57 = vector.broadcast %cst_21 : f32 to vector<32x1xf32>
    %58 = arith.addf %54, %57 : vector<32x1xf32>
    %59 = math.rsqrt %58 : vector<32x1xf32>
    %60 = vector.broadcast %59 : vector<32x1xf32> to vector<32x128xf32>
    %61 = arith.mulf %56, %60 : vector<32x128xf32>
    %62 = vector.broadcast %8 : vector<1x128xf32> to vector<32x128xf32>
    %63 = arith.mulf %61, %62 : vector<32x128xf32>
    %64 = vector.broadcast %9 : vector<1x128xf32> to vector<32x128xf32>
    %65 = arith.addf %63, %64 : vector<32x128xf32>
    %c0_22 = arith.constant 0 : index
    %c0_23 = arith.constant 0 : index
    %c0_24 = arith.constant 0 : index
    %66 = vector.load %arg5[%c0_22, %c0_23, %c0_24] : memref<1x128x256xf32, #tpu.memory_space<vmem>>, vector<1x128x256xf32>
    %67 = vector.shape_cast %66 : vector<1x128x256xf32> to vector<128x256xf32>
    %cst_25 = arith.constant dense<0.000000e+00> : vector<32x256xf32>
    %68 = tpu.matmul %65, %67, %cst_25 {dimension_numbers = #tpu.dot_dimension_numbers<[1], [0], [0], [1], [0, 0, 1, 1], [], []>} : vector<32x128xf32>, vector<128x256xf32>, vector<32x256xf32> -> vector<32x256xf32>
    %c0_26 = arith.constant 0 : index
    %c0_27 = arith.constant 0 : index
    %c0_28 = arith.constant 0 : index
    %69 = vector.load %arg7[%c0_26, %c0_27, %c0_28] : memref<1x1x256xf32, #tpu.memory_space<vmem>>, vector<1x1x256xf32>
    %70 = vector.shape_cast %69 : vector<1x1x256xf32> to vector<1x256xf32>
    %71 = vector.broadcast %70 : vector<1x256xf32> to vector<32x256xf32>
    %72 = arith.addf %68, %71 : vector<32x256xf32>
    %cst_29 = arith.constant 0.000000e+00 : f32
    %73 = vector.broadcast %cst_29 : f32 to vector<32x256xf32>
    %74 = arith.maximumf %72, %73 : vector<32x256xf32>
    %c0_30 = arith.constant 0 : index
    %c0_31 = arith.constant 0 : index
    %c0_32 = arith.constant 0 : index
    %75 = vector.load %arg6[%c0_30, %c0_31, %c0_32] : memref<1x256x128xf32, #tpu.memory_space<vmem>>, vector<1x256x128xf32>
    %76 = vector.shape_cast %75 : vector<1x256x128xf32> to vector<256x128xf32>
    %cst_33 = arith.constant dense<0.000000e+00> : vector<32x128xf32>
    %77 = tpu.matmul %74, %76, %cst_33 {dimension_numbers = #tpu.dot_dimension_numbers<[1], [0], [0], [1], [0, 0, 1, 1], [], []>} : vector<32x256xf32>, vector<256x128xf32>, vector<32x128xf32> -> vector<32x128xf32>
    %78 = vector.broadcast %7 : vector<1x128xf32> to vector<32x128xf32>
    %79 = arith.addf %77, %78 : vector<32x128xf32>
    %cst_34 = arith.constant dense<0.000000e+00> : vector<32xf32>
    %80 = vector.multi_reduction <add>, %79, %cst_34 [1] : vector<32x128xf32> to vector<32xf32>
    %81 = vector.shape_cast %80 : vector<32xf32> to vector<32x1xf32>
    %cst_35 = arith.constant 1.280000e+02 : f32
    %82 = vector.broadcast %cst_35 : f32 to vector<32x1xf32>
    %83 = arith.divf %81, %82 : vector<32x1xf32>
    %84 = vector.broadcast %83 : vector<32x1xf32> to vector<32x128xf32>
    %85 = arith.subf %79, %84 : vector<32x128xf32>
    %86 = arith.mulf %85, %85 : vector<32x128xf32>
    %cst_36 = arith.constant dense<0.000000e+00> : vector<32xf32>
    %87 = vector.multi_reduction <add>, %86, %cst_36 [1] : vector<32x128xf32> to vector<32xf32>
    %88 = vector.shape_cast %87 : vector<32xf32> to vector<32x1xf32>
    %cst_37 = arith.constant 1.280000e+02 : f32
    %89 = vector.broadcast %cst_37 : f32 to vector<32x1xf32>
    %90 = arith.divf %88, %89 : vector<32x1xf32>
    %91 = vector.broadcast %83 : vector<32x1xf32> to vector<32x128xf32>
    %92 = arith.subf %79, %91 : vector<32x128xf32>
    %cst_38 = arith.constant 9.99999974E-6 : f32
    %93 = vector.broadcast %cst_38 : f32 to vector<32x1xf32>
    %94 = arith.addf %90, %93 : vector<32x1xf32>
    %95 = math.rsqrt %94 : vector<32x1xf32>
    %96 = vector.broadcast %95 : vector<32x1xf32> to vector<32x128xf32>
    %97 = arith.mulf %92, %96 : vector<32x128xf32>
    %98 = vector.broadcast %10 : vector<1x128xf32> to vector<32x128xf32>
    %99 = arith.mulf %97, %98 : vector<32x128xf32>
    %100 = vector.broadcast %11 : vector<1x128xf32> to vector<32x128xf32>
    %101 = arith.addf %99, %100 : vector<32x128xf32>
    %c0_39 = arith.constant 0 : index
    %c0_40 = arith.constant 0 : index
    %102 = vector.load %arg10[%c0_39, %c0_40] : memref<32x128xf32, #tpu.memory_space<vmem>>, vector<32x128xf32>
    tpu.vector_store %arg10[%c0_39, %c0_40], %101 {strides = array<i32>} : memref<32x128xf32, #tpu.memory_space<vmem>>, vector<32x128xf32>,
    %c1_i32 = arith.constant 1 : i32
    %103 = arith.cmpi eq, %arg1, %c1_i32 : i32
    %104 = arith.extui %103 : i1 to i32
    %c0_i32_41 = arith.constant 0 : i32
    %105 = arith.cmpi ne, %104, %c0_i32_41 : i32
    scf.if %105 {
      %106 = vector.shape_cast %101 : vector<32x128xf32> to vector<4x8x128xf32>
      %c0_42 = arith.constant 0 : index
      %c0_43 = arith.constant 0 : index
      %c0_44 = arith.constant 0 : index
      %107 = vector.load %arg9[%c0_42, %c0_43, %c0_44] : memref<4x8x128xf32, #tpu.memory_space<vmem>>, vector<4x8x128xf32>
      tpu.vector_store %arg9[%c0_42, %c0_43, %c0_44], %106 {strides = array<i32>} : memref<4x8x128xf32, #tpu.memory_space<vmem>>, vector<4x8x128xf32>,
    } else {
    }
    return
  }
  func.func @transform_0(%arg0: i32, %arg1: i32) -> (i32, i32, i32) {
    %c0_i32 = arith.constant 0 : i32
    %c0_i32_0 = arith.constant 0 : i32
    %c0_i32_1 = arith.constant 0 : i32
    return %arg0, %c0_i32, %c0_i32_0 : i32, i32, i32
  }
  func.func @transform_1(%arg0: i32, %arg1: i32) -> (i32, i32, i32) {
    %c0_i32 = arith.constant 0 : i32
    %c0_i32_0 = arith.constant 0 : i32
    %c0_i32_1 = arith.constant 0 : i32
    return %arg1, %c0_i32, %c0_i32_0 : i32, i32, i32
  }
  func.func @transform_2(%arg0: i32, %arg1: i32) -> (i32, i32, i32) {
    %c0_i32 = arith.constant 0 : i32
    %c0_i32_0 = arith.constant 0 : i32
    %c0_i32_1 = arith.constant 0 : i32
    return %arg1, %c0_i32, %c0_i32_0 : i32, i32, i32
  }
  func.func @transform_3(%arg0: i32, %arg1: i32) -> (i32, i32, i32) {
    %c0_i32 = arith.constant 0 : i32
    %c0_i32_0 = arith.constant 0 : i32
    %c0_i32_1 = arith.constant 0 : i32
    return %arg1, %c0_i32, %c0_i32_0 : i32, i32, i32
  }
  func.func @transform_4(%arg0: i32, %arg1: i32) -> (i32, i32, i32) {
    %c0_i32 = arith.constant 0 : i32
    %c0_i32_0 = arith.constant 0 : i32
    %c0_i32_1 = arith.constant 0 : i32
    return %arg1, %c0_i32, %c0_i32_0 : i32, i32, i32
  }
  func.func @transform_5(%arg0: i32, %arg1: i32) -> (i32, i32, i32) {
    %c0_i32 = arith.constant 0 : i32
    %c0_i32_0 = arith.constant 0 : i32
    %c0_i32_1 = arith.constant 0 : i32
    return %arg1, %c0_i32, %c0_i32_0 : i32, i32, i32
  }
  func.func @transform_6(%arg0: i32, %arg1: i32) -> (i32, i32, i32) {
    %c0_i32 = arith.constant 0 : i32
    %c0_i32_0 = arith.constant 0 : i32
    %c0_i32_1 = arith.constant 0 : i32
    return %arg1, %c0_i32, %c0_i32_0 : i32, i32, i32
  }
  func.func @transform_7(%arg0: i32, %arg1: i32) -> (i32, i32, i32) {
    %c0_i32 = arith.constant 0 : i32
    %c0_i32_0 = arith.constant 0 : i32
    %c0_i32_1 = arith.constant 0 : i32
    return %arg0, %c0_i32, %c0_i32_0 : i32, i32, i32
  }
}

</mosaic_0001>

<bundles_post_ra>
// kernel: tpu_custom_call.1
= control target key start
LH: loop header
LB: loop body
LE: loop exit
PB: predicated region body
PF: predicated region fallthrough
CT: control target
= control target key end

     0   :  { %s3259_s0 = inlined_call_operand.hbm [shape: f32[4,8,128], index: 0, kind: input, shape index: {}]   ;;  %s3260_s1 = inlined_call_operand.hbm [shape: f32[2,128,768], index: 1, kind: input, shape index: {}]   ;;  %s3261_s2 = inlined_call_operand.hbm [shape: f32[2,256,128], index: 2, kind: input, shape index: {}]   ;;  %s3262_s3 = inlined_call_operand.hbm [shape: f32[2,128,256], index: 3, kind: input, shape index: {}]   ;;  %s3263_s4 = inlined_call_operand.hbm [shape: f32[2,256,128], index: 4, kind: input, shape index: {}]   ;;  %s3264_s5 = inlined_call_operand.vmem [shape: f32[2,1,256], index: 5, kind: input, shape index: {}]   ;;  %s3265_s6 = inlined_call_operand.vmem [shape: f32[2,6,128], index: 6, kind: input, shape index: {}]   ;;  %s3266_s7 = inlined_call_operand.hbm [shape: f32[4,8,128], index: 7, kind: output, shape index: {}]  }
   0x1   :  { %3268 = sst [smem:[#allocation18_spill]] %s3259_s0 }
   0x2   :  { %3269 = sst [smem:[#allocation19_spill]] %s3260_s1 }
   0x3   :  { %3270 = sst [smem:[#allocation20_spill]] %s3262_s3 }
   0x4   :  { %12 = vsyncpa [#allocation4], 0 }
   0x5   :  { %13 = vsyncpa [#allocation7], 0 }
   0x6   :  { %15 = vsyncpa [#allocation7 + $0x1], 0 }
   0x7   :  { %16 = vsyncpa [#allocation10], 0 }
   0x8   :  { %18 = vsyncpa [#allocation10 + $0x1], 0 }
   0x9   :  { %19 = vsyncpa [#allocation5], 0  ;;  %s2717_s24 = smov 0   ;;  %s2719_s25 = smov 0  }
   0xa   :  { %s2721_s26 = smov 0   ;;  %s2723_s27 = smov 0  }
   0xb   :  { %s2725_s28 = smov 0   ;;  %s2727_s29 = smov 0  }
   0xc LB: > { %s34_s30 = sadd.s32 1, %s2656_s28  ;;  %s70_s8 = sadd.s32 1, %s2648_s26  ;;  %s2660_s29 = sphi %s2727_s29, %s25_s29   ;;  %s2656_s28 = sphi %s2725_s28, %s3286_s28   ;;  %s2652_s27 = sphi %s2723_s27, %s3285_s27   ;;  %s2648_s26 = sphi %s2721_s26, %s3284_s26   ;;  %s2644_s25 = sphi %s2719_s25, %s3283_s25   ;;  %s2640_s24 = sphi %s2717_s24, %s3282_s24  }
   0xd   : > { %p35_p0 = scmp.ge.s32.totalorder %s34_s30, 2  ;;  %p77_p1 = scmp.ne.s32.totalorder %s2648_s26, %s2644_s25 }
   0xe   : > { %p78_p2 = scmp.eq.s32.totalorder %s2660_s29, 0  ;;  %p2341_p4 = scmp.lt.s32.totalorder %s2660_s29, 2 }
   0xf   : > { %s3288_s30 = smov (%p35_p0, %s34_s30), 0  ;;  %s279_s10 = sand.u32 1, %s2660_s29  }
  0x10   : > { %3271 = sst [smem:[#allocation17_spill]] %s3288_s30  ;;  %p79_p3 = por %p78_p2, %p77_p1 }
  0x11   : > { %s67_s9 = ssub.s32 %s2656_s28, %s3288_s30  ;;  %s281_s11 = sand.u32 1, %s2648_s26  }
  0x12   : > { %p68_p5 = scmp.eq.s32.totalorder %s67_s9, 0  ;;  %s2305_s12 = smul.u32 12288, %s2656_s28 }
  0x13   : > { %s2304_s14 = smul.u32 768, %s281_s11  ;;  %s3272_s1 = sld [smem:[#allocation19_spill]] }
  0x14   : > { %s2761_s13 = scalar_select %p68_p5, %s2648_s26, %s70_s8  }
  0x15   : > { %p2766_p6 = pnand %p2341_p4, %p79_p3  ;;  %s283_s19 = scalar_lea.vmem [#allocation6], %s2304_s14 }
  0x16   : > { %s290_s20 = sshll.u32 %s283_s19, 4  ;;  %s2770_s21 = sshll.u32 %s281_s11, 8  ;;  %s291_s20 = int_to_ptr.vmem [resolvable:$true] %s290_s20 }
  0x17   : > { %s2774_s22 = scalar_lea.sflag [#allocation7], %s279_s10  ;;  %p2438_p7 = pneg %p2766_p6 }
  0x18   : > { %s2449_s23 = scalar_lea.vmem %s291_s20, 12288  ;;  %s2662_s8 = smov [#allocation6]  }
  0x19   : > { %s289_s17 = scalar_lea.hbm %s3272_s1, %s2305_s12  ;;  %p2450_p8 = scmp.ne.s32.totalorder %s291_s20, %s2449_s23 }
  0x1a   : > { %s2454_s9 = sshll.u32 %s2662_s8, 4  ;;  %s2455_s9 = int_to_ptr.vmem [resolvable:$false] %s2454_s9 }
  0x1b   : > { %p2452_p9 = pnand %p2450_p8, %p2438_p7  ;;  %s2456_s12 = scalar_lea.vmem %s2455_s9, 24576 }
  0x1c   : > { %p2457_p11 = scmp.lt.s32.totalorder %s291_s20, %s2455_s9  ;;  %p2458_p12 = scmp.lt.s32.totalorder %s2456_s12, %s2449_s23 }
  0x1d   : > { %p2453_p10 = pneg %p2452_p9 }
  0x1e   : > { %p2459_p13 = por %p2458_p12, %p2457_p11 }
  0x20   : > { %p2460_p0 = pnand %p2459_p13, %p2453_p10 }
  0x22   : > { %2463 = shalt.err (!%p2460_p0)
}
  0x23   : > { %s2663_s11 = smov 768   ;;  %s2664_s14 = smov 48  }
  0x24   : > { %2330 = dma.hbm_to_vmem [thread:$0]  (!%p2766_p6), %s289_s17, 12288, %s291_s20, %s2774_s22, %s2663_s11, %s2663_s11, %s2664_s14  }
  0x25   : > { %s2785_s15 = sshll.u32 %s2656_s28, 12  ;;  %s3274_s3 = sld [smem:[#allocation20_spill]] }
  0x26   : > { %s325_s8 = scalar_lea.vmem [#allocation9], %s2770_s21  ;;  %s2794_s12 = scalar_lea.sflag [#allocation10], %s279_s10 }
  0x27   : > { %s332_s9 = sshll.u32 %s325_s8, 4  ;;  %s2665_s17 = smov [#allocation9]   ;;  %s333_s9 = int_to_ptr.vmem [resolvable:$true] %s332_s9 }
  0x28   : > { %s2477_s1 = scalar_lea.vmem %s333_s9, 4096  ;;  %s2482_s20 = sshll.u32 %s2665_s17, 4  ;;  %s2483_s20 = int_to_ptr.vmem [resolvable:$false] %s2482_s20 }
  0x29   : > { %p2478_p1 = scmp.ne.s32.totalorder %s333_s9, %s2477_s1  ;;  %s2484_s11 = scalar_lea.vmem %s2483_s20, 8192 }
  0x2a   : > { %p2485_p4 = scmp.lt.s32.totalorder %s333_s9, %s2483_s20  ;;  %p2486_p5 = scmp.lt.s32.totalorder %s2484_s11, %s2477_s1 }
  0x2b   : > { %s331_s23 = scalar_lea.hbm %s3274_s3, %s2785_s15  ;;  %p2480_p2 = pnand %p2478_p1, %p2438_p7 }
  0x2c   : > { %p2487_p8 = por %p2486_p5, %p2485_p4 }
  0x2d   : > { %p2481_p3 = pneg %p2480_p2 }
  0x2f   : > { %p2488_p9 = pnand %p2487_p8, %p2481_p3 }
  0x31   : > { %2491 = shalt.err (!%p2488_p9)
}
  0x32   : > { %s2666_s14 = smov 256   ;;  %s2667_s10 = smov 16  }
  0x33   : > { %2336 = dma.hbm_to_vmem [thread:$0]  (!%p2766_p6), %s331_s23, 4096, %s333_s9, %s2794_s12, %s2666_s14, %s2666_s14, %s2667_s10  }
  0x34   : > { %s2803_s16 = sadd.s32 4294967295, %s2660_s29   ;;  %p83_p10 = scmp.ne.s32.totalorder %s2644_s25, %s2640_s24 }
  0x35   : > { %p84_p11 = scmp.eq.s32.totalorder %s2803_s16, 0  ;;  %p2183_p12 = scmp.ge.s32.totalorder %s2660_s29, 1 }
  0x36   : > { %p250_p13 = scmp.lt.s32.totalorder %s2660_s29, 3  ;;  %s2668_s23 = smov [#allocation3]  }
  0x37   : > { %p2812_p0 = por %p84_p11, %p83_p10  ;;  %s265_s8 = sshll.u32 %s2668_s23, 4  ;;  %s266_s8 = int_to_ptr.vmem [resolvable:$true] %s265_s8 }
  0x38   : > { %p2816_p1 = pnand %p2183_p12, %p250_p13  ;;  %s304_s11 = scalar_lea.vmem [#allocation8], %s2770_s21 }
  0x39   : > { %s311_s14 = sshll.u32 %s304_s11, 4  ;;  %s2503_s30 = scalar_lea.vmem %s266_s8, 512  ;;  %s2833_s14 = int_to_ptr.vmem [resolvable:$true] %s311_s14 }
  0x3a   : > { %p2323_p2 = pneg %p2816_p1  ;;  %p2504_p5 = scmp.ne.s32.totalorder %s266_s8, %s2503_s30 }
  0x3b   : > { %p2511_p10 = scmp.lt.s32.totalorder %s266_s8, %s266_s8  ;;  %p2512_p12 = scmp.lt.s32.totalorder %s2503_s30, %s2503_s30 }
  0x3c   : > { %p2828_p3 = pnand %p2323_p2, %p84_p11 }
  0x3d   : > { %p2513_p13 = por %p2512_p12, %p2511_p10 }
  0x3e   : > { %p2494_p4 = pneg %p2828_p3 }
  0x40   : > { %p2506_p8 = pnand %p2504_p5, %p2494_p4 }
  0x42   : > { %p2507_p9 = pneg %p2506_p8 }
  0x44   : > { %p2514_p2 = pnand %p2513_p13, %p2507_p9 }
  0x46   : > { %2517 = shalt.err (!%p2514_p2)
}
  0x47   : > { %s2669_s9 = smov 128   ;;  %s2670_s24 = smov 8  }
  0x48   : > { %s3278_s0 = sld [smem:[#allocation18_spill]]  ;;  %s2531_s10 = scalar_lea.vmem %s2833_s14, 4096 }
  0x49   : > { %p2532_p4 = scmp.ne.s32.totalorder %s2833_s14, %s2531_s10  ;;  %s2671_s30 = smov [#allocation8]  }
  0x4a   : > { %s2536_s23 = sshll.u32 %s2671_s30, 4  ;;  %s2537_s23 = int_to_ptr.vmem [resolvable:$false] %s2536_s23 }
  0x4b   : > { %p2534_p5 = pnand %p2532_p4, %p2438_p7  ;;  %s2538_s17 = scalar_lea.vmem %s2537_s23, 8192 }
  0x4c   : > { %p2539_p9 = scmp.lt.s32.totalorder %s2833_s14, %s2537_s23  ;;  %p2540_p10 = scmp.lt.s32.totalorder %s2538_s17, %s2531_s10 }
  0x4d   : > { %p2535_p8 = pneg %p2534_p5 }
  0x4e   : > { %2326 = dma.hbm_to_vmem [thread:$0]  (!%p2828_p3), %s3278_s0, 512, %s266_s8, [#allocation4], %s2669_s9, %s2669_s9, %s2670_s24  }
  0x4f   : > { %p2541_p12 = por %p2540_p10, %p2539_p9 }
  0x51   : > { %p2542_p13 = pnand %p2541_p12, %p2535_p8 }
  0x53   : > { %2545 = shalt.err (!%p2542_p13)
}
  0x54   : > { %s3279_s3 = scalar_lea.hbm %s3261_s2, %s2785_s15  ;;  %s346_s23 = scalar_lea.vmem [#allocation11], %s2770_s21 }
  0x55   : > { %2333 = dma.hbm_to_vmem [thread:$0]  (!%p2766_p6), %s3279_s3, 4096, %s2833_s14, %s2774_s22, %s2669_s9, %s2669_s9, %s2670_s24  }
  0x56   : > { %s353_s17 = sshll.u32 %s346_s23, 4  ;;  %s2672_s10 = smov [#allocation11]   ;;  %s354_s17 = int_to_ptr.vmem [resolvable:$true] %s353_s17 }
  0x57   : > { %s2559_s11 = scalar_lea.vmem %s354_s17, 4096  ;;  %s2564_s30 = sshll.u32 %s2672_s10, 4  ;;  %s2565_s30 = int_to_ptr.vmem [resolvable:$false] %s2564_s30 }
  0x58   : > { %p2560_p3 = scmp.ne.s32.totalorder %s354_s17, %s2559_s11  ;;  %s2566_s0 = scalar_lea.vmem %s2565_s30, 8192 }
  0x59   : > { %p2567_p5 = scmp.lt.s32.totalorder %s354_s17, %s2565_s30  ;;  %p2568_p8 = scmp.lt.s32.totalorder %s2566_s0, %s2559_s11 }
  0x5a   : > { %p2562_p2 = pnand %p2560_p3, %p2438_p7 }
  0x5b   : > { %p2569_p9 = por %p2568_p8, %p2567_p5 }
  0x5c   : > { %p2563_p4 = pneg %p2562_p2 }
  0x5e   : > { %p2570_p10 = pnand %p2569_p9, %p2563_p4 }
  0x60   : > { %2573 = shalt.err (!%p2570_p10)
}
  0x61   : > { %s3280_s14 = scalar_lea.hbm %s3263_s4, %s2785_s15  ;;  %379 = sbr.rel (%p2816_p1) target bundleno = 2304 (0x900), region = 48 }
  0x62   : > { %2339 = dma.hbm_to_vmem [thread:$0]  (!%p2766_p6), %s3280_s14, 4096, %s354_s17, %s2794_s12, %s2669_s9, %s2669_s9, %s2670_s24  }
  0x66   : > { %2623 = dma.done.wait (%p84_p11), [#allocation4], 512  }
  0x67   : > { %2625 = vsyncadd (%p84_p11), [#allocation4], 4294966784  ;;  %s385_s0 = sand.u32 1, %s2803_s16   ;;  %s387_s18 = sand.u32 1, %s2644_s25  }
  0x68   : > { %s2306_s8 = smul.u32 768, %s387_s18  ;;  %s386_s20 = scalar_lea.sflag [#allocation7], %s385_s0 }
  0x6a   : > { %s2890_s3 = scalar_lea.vmem [#allocation6], %s2306_s8 }
  0x6b   : > { %2627 = dma.done.wait (%p2812_p0), %s386_s20, 16384  }
  0x6c   : > { %2629 = vsyncadd (%p2812_p0), %s386_s20, 4294950912  ;;  %s2198_s15 = sshll.u32 %s387_s18, 8  ;;  %s404_s19 = scalar_lea.sflag [#allocation10], %s385_s0 }
  0x6d   : > { %s2896_s12 = scalar_lea.vmem [#allocation8], %s2198_s15  ;;  %s2898_s9 = scalar_lea.vmem [#allocation9], %s2198_s15 }
  0x6e   : > { %2631 = dma.done.wait (%p2812_p0), %s404_s19, 8192  }
  0x6f   : > { %2633 = vsyncadd (%p2812_p0), %s404_s19, 4294959104  ;;  %p466_p6 = scmp.lt.s32.totalorder %s2652_s27, 1  ;;  %s2916_s0 = scalar_lea.vmem [#allocation11], %s2198_s15 }
  0x70   : > { %p2203_p7 = scmp.ne.s32.totalorder %s2652_s27, 0 }
  0x71   : > { %s467_s24 = scalar_select %p466_p6, %s2652_s27, 1 }
  0x72   : > { %478 = sbr.rel (%p2203_p7) target bundleno = 122 (0x7a), region = 72 }
  0x73   : > { %s2201_s23 = sshll.u32 %s467_s24, 1  ;;  %s2202_s17 = sshll.u32 %s467_s24, 3 }
  0x74   : > { %s2909_s30 = scalar_lea.vmem %s3264_s5, %s2201_s23  ;;  %s2914_s14 = scalar_lea.vmem %s3265_s6, %s2202_s17 }
  0x77   : > { %v479_v0 = vld [vmem:[#allocation3] sm:$0xff]  ;;  %v480_v1 = vld [vmem:[#allocation3 + $0x8] sm:$0xff]  ;;  %v481_v2 = vld [vmem:[#allocation3 + $0x10] sm:$0xff] }
  0x78   : > { %483 = vst [vmem:[#allocation2 + $0x10] sm:$0xff] %v479_v0  ;;  %484 = vst [vmem:[#allocation2] sm:$0xff] %v480_v1  ;;  %v482_v3 = vld [vmem:[#allocation3 + $0x18] sm:$0xff] }
  0x79   : > { %485 = vst [vmem:[#allocation2 + $0x18] sm:$0xff] %v481_v2  ;;  %486 = vst [vmem:[#allocation2 + $0x8] sm:$0xff] %v482_v3 }
  0x7a PF: > { %v585_v4 = vld [vmem:[%s2890_s3 + $0x2e8] sm:$0xff]  ;;  %v584_v5 = vld [vmem:[%s2890_s3 + $0x2e0] sm:$0xff]  ;;  %v579_v6 = vld [vmem:[%s2890_s3 + $0x2b8] sm:$0xff]  ;;  %v2673_v10 = vmov 0.0   ;;  %vm1135_vm0 = vcmask 64512   ;;  %p2208_p11 = scmp.ne.s32.totalorder %s2652_s27, 1 }
  0x7b   : > { %677 = vmatprep.subr.mxu1 %v585_v4  ;;  %v583_v7 = vld [vmem:[%s2890_s3 + $0x2d8] sm:$0xff]  ;;  %v578_v8 = vld [vmem:[%s2890_s3 + $0x2b0] sm:$0xff]  ;;  %741 = vmatprep.mubr.f32.mxu1 %v2673_v10  ;;  %v573_v11 = vld [vmem:[%s2890_s3 + $0x288] sm:$0xff] }
  0x7c   : > { %v582_v9 = vld [vmem:[%s2890_s3 + $0x2d0] sm:$0xff]  ;;  %678 = vmatpush1.msra.mxu1 %v584_v5  ;;  %588 = vmatprep.subr.mxu0 %v583_v7  ;;  %v577_v12 = vld [vmem:[%s2890_s3 + $0x2a8] sm:$0xff]  ;;  %v572_v13 = vld [vmem:[%s2890_s3 + $0x280] sm:$0xff] }
  0x7d   : > { %679 = vmatprep.subr.mxu1 %v579_v6  ;;  %589 = vmatpush1.msra.mxu0 %v582_v9  ;;  %v576_v14 = vld [vmem:[%s2890_s3 + $0x2a0] sm:$0xff]  ;;  %v571_v15 = vld [vmem:[%s2890_s3 + $0x278] sm:$0xff]  ;;  %v570_v17 = vld [vmem:[%s2890_s3 + $0x270] sm:$0xff] }
  0x7e   : > { %680 = vmatpush1.msra.mxu1 %v578_v8  ;;  %590 = vmatprep.subr.mxu0 %v577_v12  ;;  %v567_v16 = vld [vmem:[%s2890_s3 + $0x258] sm:$0xff]  ;;  %v566_v18 = vld [vmem:[%s2890_s3 + $0x250] sm:$0xff]  ;;  %v565_v19 = vld [vmem:[%s2890_s3 + $0x248] sm:$0xff] }
  0x7f   : > { %681 = vmatprep.subr.mxu1 %v573_v11  ;;  %591 = vmatpush1.msra.mxu0 %v576_v14  ;;  %v561_v20 = vld [vmem:[%s2890_s3 + $0x228] sm:$0xff]  ;;  %v564_v21 = vld [vmem:[%s2890_s3 + $0x240] sm:$0xff]  ;;  %v559_v23 = vld [vmem:[%s2890_s3 + $0x218] sm:$0xff] }
  0x80   : > { %682 = vmatpush1.msra.mxu1 %v572_v13  ;;  %592 = vmatprep.subr.mxu0 %v571_v15  ;;  %v560_v22 = vld [vmem:[%s2890_s3 + $0x220] sm:$0xff]  ;;  %v555_v24 = vld [vmem:[%s2890_s3 + $0x1f8] sm:$0xff]  ;;  %v558_v25 = vld [vmem:[%s2890_s3 + $0x210] sm:$0xff] }
  0x81   : > { %683 = vmatprep.subr.mxu1 %v567_v16  ;;  %593 = vmatpush1.msra.mxu0 %v570_v17  ;;  %v554_v26 = vld [vmem:[%s2890_s3 + $0x1f0] sm:$0xff]  ;;  %v553_v27 = vld [vmem:[%s2890_s3 + $0x1e8] sm:$0xff]  ;;  %v552_v29 = vld [vmem:[%s2890_s3 + $0x1e0] sm:$0xff] }
  0x82   : > { %684 = vmatpush1.msra.mxu1 %v566_v18  ;;  %594 = vmatprep.subr.mxu0 %v565_v19  ;;  %v549_v28 = vld [vmem:[%s2890_s3 + $0x1c8] sm:$0xff]  ;;  %v548_v30 = vld [vmem:[%s2890_s3 + $0x1c0] sm:$0xff]  ;;  %v547_v31 = vld [vmem:[%s2890_s3 + $0x1b8] sm:$0xff] }
  0x83   : > { %685 = vmatprep.subr.mxu1 %v561_v20  ;;  %595 = vmatpush1.msra.mxu0 %v564_v21  ;;  %v543_v32 = vld [vmem:[%s2890_s3 + $0x198] sm:$0xff]  ;;  %v546_v33 = vld [vmem:[%s2890_s3 + $0x1b0] sm:$0xff]  ;;  %v541_v35 = vld [vmem:[%s2890_s3 + $0x188] sm:$0xff] }
  0x84   : > { %686 = vmatpush1.msra.mxu1 %v560_v22  ;;  %596 = vmatprep.subr.mxu0 %v559_v23  ;;  %v542_v34 = vld [vmem:[%s2890_s3 + $0x190] sm:$0xff]  ;;  %v537_v36 = vld [vmem:[%s2890_s3 + $0x168] sm:$0xff]  ;;  %v540_v37 = vld [vmem:[%s2890_s3 + $0x180] sm:$0xff] }
  0x85   : > { %687 = vmatprep.subr.mxu1 %v555_v24  ;;  %597 = vmatpush1.msra.mxu0 %v558_v25  ;;  %v536_v38 = vld [vmem:[%s2890_s3 + $0x160] sm:$0xff]  ;;  %v535_v39 = vld [vmem:[%s2890_s3 + $0x158] sm:$0xff]  ;;  %v534_v41 = vld [vmem:[%s2890_s3 + $0x150] sm:$0xff] }
  0x86   : > { %688 = vmatpush1.msra.mxu1 %v554_v26  ;;  %598 = vmatprep.subr.mxu0 %v553_v27  ;;  %v531_v40 = vld [vmem:[%s2890_s3 + $0x138] sm:$0xff]  ;;  %v530_v42 = vld [vmem:[%s2890_s3 + $0x130] sm:$0xff]  ;;  %v529_v43 = vld [vmem:[%s2890_s3 + $0x128] sm:$0xff] }
  0x87   : > { %689 = vmatprep.subr.mxu1 %v549_v28  ;;  %599 = vmatpush1.msra.mxu0 %v552_v29  ;;  %v525_v44 = vld [vmem:[%s2890_s3 + $0x108] sm:$0xff]  ;;  %v528_v45 = vld [vmem:[%s2890_s3 + $0x120] sm:$0xff]  ;;  %v523_v47 = vld [vmem:[%s2890_s3 + $0xf8] sm:$0xff] }
  0x88   : > { %690 = vmatpush1.msra.mxu1 %v548_v30  ;;  %600 = vmatprep.subr.mxu0 %v547_v31  ;;  %v524_v46 = vld [vmem:[%s2890_s3 + $0x100] sm:$0xff]  ;;  %v519_v48 = vld [vmem:[%s2890_s3 + $0xd8] sm:$0xff]  ;;  %v522_v49 = vld [vmem:[%s2890_s3 + $0xf0] sm:$0xff] }
  0x89   : > { %691 = vmatprep.subr.mxu1 %v543_v32  ;;  %601 = vmatpush1.msra.mxu0 %v546_v33  ;;  %v518_v50 = vld [vmem:[%s2890_s3 + $0xd0] sm:$0xff]  ;;  %v517_v51 = vld [vmem:[%s2890_s3 + $0xc8] sm:$0xff]  ;;  %v516_v53 = vld [vmem:[%s2890_s3 + $0xc0] sm:$0xff] }
  0x8a   : > { %692 = vmatpush1.msra.mxu1 %v542_v34  ;;  %602 = vmatprep.subr.mxu0 %v541_v35  ;;  %v513_v52 = vld [vmem:[%s2890_s3 + $0xa8] sm:$0xff]  ;;  %v512_v54 = vld [vmem:[%s2890_s3 + $0xa0] sm:$0xff]  ;;  %v511_v55 = vld [vmem:[%s2890_s3 + $0x98] sm:$0xff] }
  0x8b   : > { %693 = vmatprep.subr.mxu1 %v537_v36  ;;  %603 = vmatpush1.msra.mxu0 %v540_v37  ;;  %v507_v56 = vld [vmem:[%s2890_s3 + $0x78] sm:$0xff]  ;;  %v510_v57 = vld [vmem:[%s2890_s3 + $0x90] sm:$0xff]  ;;  %v505_v59 = vld [vmem:[%s2890_s3 + $0x68] sm:$0xff] }
  0x8c   : > { %694 = vmatpush1.msra.mxu1 %v536_v38  ;;  %604 = vmatprep.subr.mxu0 %v535_v39  ;;  %v506_v58 = vld [vmem:[%s2890_s3 + $0x70] sm:$0xff]  ;;  %v501_v60 = vld [vmem:[%s2890_s3 + $0x48] sm:$0xff]  ;;  %v504_v61 = vld [vmem:[%s2890_s3 + $0x60] sm:$0xff] }
  0x8d   : > { %695 = vmatprep.subr.mxu1 %v531_v40  ;;  %605 = vmatpush1.msra.mxu0 %v534_v41  ;;  %v500_v62 = vld [vmem:[%s2890_s3 + $0x40] sm:$0xff]  ;;  %v499_v63 = vld [vmem:[%s2890_s3 + $0x38] sm:$0xff]  ;;  %v498_v1 = vld [vmem:[%s2890_s3 + $0x30] sm:$0xff] }
  0x8e   : > { %696 = vmatpush1.msra.mxu1 %v530_v42  ;;  %606 = vmatprep.subr.mxu0 %v529_v43  ;;  %v495_v0 = vld [vmem:[%s2890_s3 + $0x18] sm:$0xff]  ;;  %v494_v2 = vld [vmem:[%s2890_s3 + $0x10] sm:$0xff]  ;;  %v493_v3 = vld [vmem:[%s2890_s3 + $0x8] sm:$0xff] }
  0x8f   : > { %697 = vmatprep.subr.mxu1 %v525_v44  ;;  %607 = vmatpush1.msra.mxu0 %v528_v45  ;;  %v2983_v4 = vld [vmem:[#allocation2 + $0x10] sm:$0xff]  ;;  %v492_v5 = vld [vmem:[%s2890_s3] sm:$0xff]  ;;  %v2995_v7 = vld [vmem:[#allocation2 + $0x18] sm:$0xff] }
  0x90   : > { %698 = vmatpush1.msra.mxu1 %v524_v46  ;;  %608 = vmatprep.subr.mxu0 %v523_v47  ;;  %v2989_v6 = vld [vmem:[#allocation2] sm:$0xff]  ;;  %v3001_v8 = vld [vmem:[#allocation2 + $0x8] sm:$0xff]  ;;  %v587_v26 = vld [vmem:[%s2890_s3 + $0x2f8] sm:$0xff] }
  0x91   : > { %699 = vmatprep.subr.mxu1 %v519_v48  ;;  %609 = vmatpush1.msra.mxu0 %v522_v49  ;;  %v586_v27 = vld [vmem:[%s2890_s3 + $0x2f0] sm:$0xff]  ;;  %v581_v28 = vld [vmem:[%s2890_s3 + $0x2c8] sm:$0xff]  ;;  %v580_v29 = vld [vmem:[%s2890_s3 + $0x2c0] sm:$0xff] }
  0x92   : > { %700 = vmatpush1.msra.mxu1 %v518_v50  ;;  %610 = vmatprep.subr.mxu0 %v517_v51  ;;  %v575_v30 = vld [vmem:[%s2890_s3 + $0x298] sm:$0xff]  ;;  %v574_v31 = vld [vmem:[%s2890_s3 + $0x290] sm:$0xff]  ;;  %v569_v32 = vld [vmem:[%s2890_s3 + $0x268] sm:$0xff] }
  0x93   : > { %701 = vmatprep.subr.mxu1 %v513_v52  ;;  %611 = vmatpush1.msra.mxu0 %v516_v53  ;;  %v568_v33 = vld [vmem:[%s2890_s3 + $0x260] sm:$0xff]  ;;  %v563_v34 = vld [vmem:[%s2890_s3 + $0x238] sm:$0xff]  ;;  %v562_v35 = vld [vmem:[%s2890_s3 + $0x230] sm:$0xff] }
  0x94   : > { %702 = vmatpush1.msra.mxu1 %v512_v54  ;;  %612 = vmatprep.subr.mxu0 %v511_v55  ;;  %v557_v36 = vld [vmem:[%s2890_s3 + $0x208] sm:$0xff]  ;;  %v556_v37 = vld [vmem:[%s2890_s3 + $0x200] sm:$0xff]  ;;  %v551_v38 = vld [vmem:[%s2890_s3 + $0x1d8] sm:$0xff] }
  0x95   : > { %703 = vmatprep.subr.mxu1 %v507_v56  ;;  %613 = vmatpush1.msra.mxu0 %v510_v57  ;;  %v550_v39 = vld [vmem:[%s2890_s3 + $0x1d0] sm:$0xff]  ;;  %v545_v40 = vld [vmem:[%s2890_s3 + $0x1a8] sm:$0xff]  ;;  %v544_v41 = vld [vmem:[%s2890_s3 + $0x1a0] sm:$0xff] }
  0x96   : > { %704 = vmatpush1.msra.mxu1 %v506_v58  ;;  %614 = vmatprep.subr.mxu0 %v505_v59  ;;  %v539_v42 = vld [vmem:[%s2890_s3 + $0x178] sm:$0xff]  ;;  %v538_v43 = vld [vmem:[%s2890_s3 + $0x170] sm:$0xff]  ;;  %v533_v44 = vld [vmem:[%s2890_s3 + $0x148] sm:$0xff] }
  0x97   : > { %705 = vmatprep.subr.mxu1 %v501_v60  ;;  %615 = vmatpush1.msra.mxu0 %v504_v61  ;;  %v532_v45 = vld [vmem:[%s2890_s3 + $0x140] sm:$0xff]  ;;  %v527_v46 = vld [vmem:[%s2890_s3 + $0x118] sm:$0xff]  ;;  %v526_v47 = vld [vmem:[%s2890_s3 + $0x110] sm:$0xff] }
  0x98   : > { %706 = vmatpush1.msra.mxu1 %v500_v62  ;;  %616 = vmatprep.subr.mxu0 %v499_v63  ;;  %v521_v48 = vld [vmem:[%s2890_s3 + $0xe8] sm:$0xff]  ;;  %v520_v49 = vld [vmem:[%s2890_s3 + $0xe0] sm:$0xff]  ;;  %v515_v50 = vld [vmem:[%s2890_s3 + $0xb8] sm:$0xff] }
  0x99   : > { %707 = vmatprep.subr.mxu1 %v495_v0  ;;  %617 = vmatpush1.msra.mxu0 %v498_v1  ;;  %v514_v51 = vld [vmem:[%s2890_s3 + $0xb0] sm:$0xff]  ;;  %v509_v52 = vld [vmem:[%s2890_s3 + $0x88] sm:$0xff]  ;;  %v508_v53 = vld [vmem:[%s2890_s3 + $0x80] sm:$0xff] }
  0x9a   : > { %708 = vmatpush1.msra.mxu1 %v494_v2  ;;  %618 = vmatprep.subr.mxu0 %v493_v3  ;;  %v503_v54 = vld [vmem:[%s2890_s3 + $0x58] sm:$0xff]  ;;  %v502_v55 = vld [vmem:[%s2890_s3 + $0x50] sm:$0xff]  ;;  %v497_v56 = vld [vmem:[%s2890_s3 + $0x28] sm:$0xff] }
  0x9b   : > { %742 = vmatmul.mubr.f32.vlgmr.msra.gmra.mxu1 %v2983_v4  ;;  %619 = vmatpush1.msra.mxu0 %v492_v5  ;;  %v496_v57 = vld [vmem:[%s2890_s3 + $0x20] sm:$0xff] }
  0x9c   : > { %652 = vmatprep.mubr.f32.mxu0 %v2673_v10  ;;  %747 = vmatprep.mubr.f32.mxu1 %v2673_v10 }
  0x9d   : > { %653 = vmatmul.mubr.f32.vlgmr.msra.gmra.mxu0 %v2983_v4  ;;  %766 = vmatprep.subr.mxu0 %v587_v26 }
  0x9e   : > { %658 = vmatprep.mubr.f32.mxu0 %v2673_v10  ;;  %767 = vmatpush1.msra.mxu0 %v586_v27 }
  0x9f   : > { %748 = vmatmul.mubr.f32.gmra.mxu1 %v2989_v6  ;;  %768 = vmatprep.subr.mxu0 %v581_v28 }
  0xa0   : > { %753 = vmatprep.mubr.f32.mxu1 %v2673_v10  ;;  %769 = vmatpush1.msra.mxu0 %v580_v29 }
  0xa1   : > { %659 = vmatmul.mubr.f32.gmra.mxu0 %v2989_v6  ;;  %770 = vmatprep.subr.mxu0 %v575_v30 }
  0xa2   : > { %664 = vmatprep.mubr.f32.mxu0 %v2673_v10  ;;  %771 = vmatpush1.msra.mxu0 %v574_v31 }
  0xa3   : > { %754 = vmatmul.mubr.f32.gmra.mxu1 %v2995_v7  ;;  %772 = vmatprep.subr.mxu0 %v569_v32 }
  0xa4   : > { %759 = vmatprep.mubr.f32.mxu1 %v2673_v10  ;;  %773 = vmatpush1.msra.mxu0 %v568_v33 }
  0xa5   : > { %665 = vmatmul.mubr.f32.gmra.mxu0 %v2995_v7  ;;  %774 = vmatprep.subr.mxu0 %v563_v34 }
  0xa6   : > { %670 = vmatprep.mubr.f32.mxu0 %v2673_v10  ;;  %775 = vmatpush1.msra.mxu0 %v562_v35  ;;  %v1519_v35 = vld [vmem:[%s2896_s12 + $0xf8] sm:$0xff] }
  0xa7   : > { %760 = vmatmul.mubr.f32.gmra.mxu1 %v3001_v8  ;;  %776 = vmatprep.subr.mxu0 %v557_v36  ;;  %v1503_v36 = vld [vmem:[%s2896_s12 + $0x78] sm:$0xff] }
  0xa8   : > { %777 = vmatpush1.msra.mxu0 %v556_v37  ;;  %v1518_v37 = vld [vmem:[%s2896_s12 + $0xf0] sm:$0xff] }
  0xa9   : > { %671 = vmatmul.mubr.f32.gmra.mxu0 %v3001_v8  ;;  %778 = vmatprep.subr.mxu0 %v551_v38  ;;  %v1502_v38 = vld [vmem:[%s2896_s12 + $0x70] sm:$0xff] }
  0xaa   : > { %830 = vmatprep.mubr.f32.mxu0 %v2673_v10  ;;  %779 = vmatpush1.msra.mxu0 %v550_v39  ;;  %v1517_v39 = vld [vmem:[%s2896_s12 + $0xe8] sm:$0xff] }
  0xab   : > { %780 = vmatprep.subr.mxu0 %v545_v40  ;;  %v1501_v40 = vld [vmem:[%s2896_s12 + $0x68] sm:$0xff] }
  0xac   : > { %781 = vmatpush1.msra.mxu0 %v544_v41  ;;  %v1516_v41 = vld [vmem:[%s2896_s12 + $0xe0] sm:$0xff] }
  0xad   : > { %782 = vmatprep.subr.mxu0 %v539_v42  ;;  %v1500_v42 = vld [vmem:[%s2896_s12 + $0x60] sm:$0xff] }
  0xae   : > { %783 = vmatpush1.msra.mxu0 %v538_v43  ;;  %v1515_v43 = vld [vmem:[%s2896_s12 + $0xd8] sm:$0xff] }
  0xaf   : > { %784 = vmatprep.subr.mxu0 %v533_v44  ;;  %v1499_v44 = vld [vmem:[%s2896_s12 + $0x58] sm:$0xff] }
  0xb0   : > { %785 = vmatpush1.msra.mxu0 %v532_v45  ;;  %v1514_v45 = vld [vmem:[%s2896_s12 + $0xd0] sm:$0xff] }
  0xb1   : > { %786 = vmatprep.subr.mxu0 %v527_v46  ;;  %v1498_v46 = vld [vmem:[%s2896_s12 + $0x50] sm:$0xff] }
  0xb2   : > { %787 = vmatpush1.msra.mxu0 %v526_v47  ;;  %v1513_v47 = vld [vmem:[%s2896_s12 + $0xc8] sm:$0xff] }
  0xb3   : > { %788 = vmatprep.subr.mxu0 %v521_v48  ;;  %v1497_v48 = vld [vmem:[%s2896_s12 + $0x48] sm:$0xff] }
  0xb4   : > { %789 = vmatpush1.msra.mxu0 %v520_v49  ;;  %v1512_v49 = vld [vmem:[%s2896_s12 + $0xc0] sm:$0xff] }
  0xb5   : > { %790 = vmatprep.subr.mxu0 %v515_v50  ;;  %v1496_v50 = vld [vmem:[%s2896_s12 + $0x40] sm:$0xff] }
  0xb6   : > { %791 = vmatpush1.msra.mxu0 %v514_v51  ;;  %v1511_v51 = vld [vmem:[%s2896_s12 + $0xb8] sm:$0xff] }
  0xb7   : > { %792 = vmatprep.subr.mxu0 %v509_v52  ;;  %v1495_v52 = vld [vmem:[%s2896_s12 + $0x38] sm:$0xff] }
  0xb8   : > { %793 = vmatpush1.msra.mxu0 %v508_v53  ;;  %v1510_v53 = vld [vmem:[%s2896_s12 + $0xb0] sm:$0xff] }
  0xb9   : > { %794 = vmatprep.subr.mxu0 %v503_v54  ;;  %v1494_v54 = vld [vmem:[%s2896_s12 + $0x30] sm:$0xff] }
  0xba   : > { %795 = vmatpush1.msra.mxu0 %v502_v55  ;;  %v1509_v55 = vld [vmem:[%s2896_s12 + $0xa8] sm:$0xff] }
  0xbb   : > { %796 = vmatprep.subr.mxu0 %v497_v56  ;;  %v1493_v56 = vld [vmem:[%s2896_s12 + $0x28] sm:$0xff] }
  0xbc   : > { %797 = vmatpush1.msra.mxu0 %v496_v57  ;;  %v1508_v57 = vld [vmem:[%s2896_s12 + $0xa0] sm:$0xff] }
  0xbd   : > { %831 = vmatmul.mubr.f32.vlgmr.msra.gmra.mxu0 %v2983_v4  ;;  %2216 = vmatprep.subr.mxu0 %v1519_v35  ;;  %v1489_v35 = vld [vmem:[%s2896_s12 + $0x8] sm:$0xff] }
  0xbe   : > { %836 = vmatprep.mubr.f32.mxu0 %v2673_v10  ;;  %2217 = vmatpush3.msra.mxu0 %v1503_v36  ;;  %v1504_v36 = vld [vmem:[%s2896_s12 + $0x80] sm:$0xff] }
  0xbf   : > { %2218 = vmatprep.subr.mxu0 %v1518_v37 }
  0xc0   : > { %2219 = vmatpush3.msra.mxu0 %v1502_v38 }
  0xc1   : > { %837 = vmatmul.mubr.f32.gmra.mxu0 %v2989_v6  ;;  %2220 = vmatprep.subr.mxu0 %v1517_v39 }
  0xc2   : > { %842 = vmatprep.mubr.f32.mxu0 %v2673_v10  ;;  %2221 = vmatpush3.msra.mxu0 %v1501_v40 }
  0xc3   : > { %2222 = vmatprep.subr.mxu0 %v1516_v41 }
  0xc4   : > { %2223 = vmatpush3.msra.mxu0 %v1500_v42 }
  0xc5   : > { %843 = vmatmul.mubr.f32.gmra.mxu0 %v2995_v7  ;;  %2224 = vmatprep.subr.mxu0 %v1515_v43 }
  0xc6   : > { %848 = vmatprep.mubr.f32.mxu0 %v2673_v10  ;;  %2225 = vmatpush3.msra.mxu0 %v1499_v44  ;;  %v1520_v44 = vlaneseq }
  0xc7   : > { %2226 = vmatprep.subr.mxu0 %v1514_v45 }
  0xc8   : > { %2227 = vmatpush3.msra.mxu0 %v1498_v46  ;;  %v3115_v45 = vshrl.u32 %v1520_v44, 7  ;;  %v1683_v44 = vld [vmem:[%s2898_s9 + $0x48] sm:$0xff] }
  0xc9   : > { %849 = vmatmul.mubr.f32.gmra.mxu0 %v3001_v8  ;;  %2228 = vmatprep.subr.mxu0 %v1513_v47  ;;  %v3119_v47 = vld [vmem:[%s2914_s14] sm:$0x3f] }
  0xca   : > { %2229 = vmatpush3.msra.mxu0 %v1497_v48  ;;  %v1522_v46 = vsub.s32 0, %v3115_v45 }
  0xcb   : > { %2230 = vmatprep.subr.mxu0 %v1512_v49 }
  0xcc   : > { %2231 = vmatpush3.msra.mxu0 %v1496_v50  ;;  %v1523_v49 = vrot.slane %v3119_v47, %v1522_v46 }
  0xcd   : > { %2232 = vmatprep.subr.mxu0 %v1511_v51 }
  0xce   : > { %2233 = vmatpush3.msra.mxu0 %v1495_v52 }
  0xcf   : > { %2234 = vmatprep.subr.mxu0 %v1510_v53 }
  0xd0   : > { %2235 = vmatpush3.msra.mxu0 %v1494_v54 }
  0xd1   : > { %2236 = vmatprep.subr.mxu0 %v1509_v55 }
  0xd2   : > { %2237 = vmatpush3.msra.mxu0 %v1493_v56 }
  0xd3   : > { %2238 = vmatprep.subr.mxu0 %v1508_v57 }
 0x15b   : > { %v743_v9 = vpop.f32.mrf.mxu1 }
 0x15d   : > { %v745_v11 = vpop.f32.mrf.mxu1  ;;  %v654_v12 = vpop.f32.mrf.mxu0 }
 0x15e   : > { %885 = vmatprep.subr.mxu1 %v745_v11 }
 0x15f   : > { %v749_v13 = vpop.f32.mrf.mxu1  ;;  %886 = vmatpush1.xpose.msra.mxu1 %v743_v9  ;;  %v656_v14 = vpop.f32.mrf.mxu0 }
 0x160   : > { %919 = vmatprep.mubr.f32.mxu1 %v656_v14 }
 0x161   : > { %v751_v15 = vpop.f32.mrf.mxu1  ;;  %v660_v16 = vpop.f32.mrf.mxu0 }
 0x162   : > { %920 = vmatmul.mubr.f32.vlgmr.msra.gmra.mxu1 %v654_v12  ;;  %955 = vmatprep.subr.mxu1 %v751_v15 }
 0x163   : > { %v755_v17 = vpop.f32.mrf.mxu1  ;;  %956 = vmatpush1.xpose.msra.mxu1 %v749_v13  ;;  %v662_v18 = vpop.f32.mrf.mxu0 }
 0x164   : > { %989 = vmatprep.mubr.f32.mxu1 %v662_v18 }
 0x165   : > { %v757_v19 = vpop.f32.mrf.mxu1  ;;  %v666_v20 = vpop.f32.mrf.mxu0 }
 0x166   : > { %990 = vmatmul.mubr.f32.vlgmr.msra.gmra.mxu1 %v660_v16  ;;  %1025 = vmatprep.subr.mxu1 %v757_v19 }
 0x167   : > { %v761_v21 = vpop.f32.mrf.mxu1  ;;  %1026 = vmatpush1.xpose.msra.mxu1 %v755_v17  ;;  %v668_v22 = vpop.f32.mrf.mxu0 }
 0x168   : > { %1059 = vmatprep.mubr.f32.mxu1 %v668_v22 }
 0x169   : > { %v763_v23 = vpop.f32.mrf.mxu1  ;;  %v672_v24 = vpop.f32.mrf.mxu0 }
 0x16a   : > { %1060 = vmatmul.mubr.f32.vlgmr.msra.gmra.mxu1 %v666_v20  ;;  %1095 = vmatprep.subr.mxu1 %v763_v23 }
 0x16b   : > { %1096 = vmatpush1.xpose.msra.mxu1 %v761_v21  ;;  %v674_v25 = vpop.f32.mrf.mxu0 }
 0x16c   : > { %1129 = vmatprep.mubr.f32.mxu1 %v674_v25 }
 0x16e   : > { %1130 = vmatmul.mubr.f32.vlgmr.msra.gmra.mxu1 %v672_v24 }
 0x16f   : > { %1259 = vmatprep.mubr.f32.mxu1 %v2673_v10 }
 0x17d   : > { %v832_v31 = vpop.f32.mrf.mxu0 }
 0x17f   : > { %v834_v32 = vpop.f32.mrf.mxu0 }
 0x180   : > { %1225 = vmatprep.subr.mxu1 %v834_v32 }
 0x181   : > { %v3068_v33 = vpop.f32.mrf.mxu0  ;;  %1226 = vmatpush1.msra.mxu1 %v832_v31 }
 0x183   : > { %v840_v34 = vpop.f32.mrf.mxu0 }
 0x184   : > { %1299 = vmatprep.subr.mxu1 %v840_v34  ;;  %v1505_v34 = vld [vmem:[%s2896_s12 + $0x88] sm:$0xff] }
 0x222   : > { %v921_v58 = vpop.f32.mrf.mxu1 }
 0x223   : > { %v1136_v59 = vsel %vm1135_vm0, %v921_v58, -inf }
 0x224   : > { %1137 = vmax.xlane.f32.xlu0 %v1136_v59  ;;  %v923_v60 = vpop.f32.mrf.mxu1  ;;  %v1507_v59 = vld [vmem:[%s2896_s12 + $0x98] sm:$0xff] }
 0x225   : > { %v1491_v60 = vld [vmem:[%s2896_s12 + $0x18] sm:$0xff] }
 0x226   : > { %v991_v61 = vpop.f32.mrf.mxu1 }
 0x227   : > { %v1139_v62 = vsel %vm1135_vm0, %v991_v61, -inf }
 0x228   : > { %1140 = vmax.xlane.f32.xlu0 %v1139_v62  ;;  %v993_v63 = vpop.f32.mrf.mxu1  ;;  %v1490_v62 = vld [vmem:[%s2896_s12 + $0x10] sm:$0xff] }
 0x22a   : > { %v1061_v0 = vpop.f32.mrf.mxu1 }
 0x22b   : > { %v1142_v1 = vsel %vm1135_vm0, %v1061_v0, -inf }
 0x22c   : > { %1143 = vmax.xlane.f32.xlu1 %v1142_v1  ;;  %v1063_v2 = vpop.f32.mrf.mxu1 }
 0x22e   : > { %v1131_v3 = vpop.f32.mrf.mxu1 }
 0x22f   : > { %v1145_v5 = vsel %vm1135_vm0, %v1131_v3, -inf }
 0x230   : > { %1146 = vmax.xlane.f32.xlu1 %v1145_v5  ;;  %v1133_v9 = vpop.f32.mrf.mxu1  ;;  %v844_v5 = vpop.f32.mrf.mxu0 }
 0x2ad   : > { %v1138_v11 = vpop.xlane.xlu0 %1137 }
 0x2ae   : > { %v1148_v12 = vsub.f32 %v921_v58, %v1138_v11  ;;  %v1492_v58 = vld [vmem:[%s2896_s12 + $0x20] sm:$0xff] }
 0x2af   : > { %2239 = vmatpush3.msra.mxu0 %v1492_v58 }
 0x2b0   : > { %v1152_v13 = vmul.f32 1.442695, %v1148_v12  ;;  %2240 = vmatprep.subr.mxu0 %v1507_v59 }
 0x2b1   : > { %v1141_v14 = vpop.xlane.xlu0 %1140  ;;  %2241 = vmatpush3.msra.mxu0 %v1491_v60 }
 0x2b2   : > { %2404 = vpow2.f32 %v1152_v13  ;;  %v1149_v15 = vsub.f32 %v991_v61, %v1141_v14  ;;  %v1506_v61 = vld [vmem:[%s2896_s12 + $0x90] sm:$0xff]  ;;  %v846_v13 = vpop.f32.mrf.mxu0 }
 0x2b3   : > { %2242 = vmatprep.subr.mxu0 %v1506_v61 }
 0x2b4   : > { %v1154_v16 = vmul.f32 1.442695, %v1149_v15  ;;  %2243 = vmatpush3.msra.mxu0 %v1490_v62 }
 0x2b5   : > { %v1144_v17 = vpop.xlane.xlu1 %1143  ;;  %2244 = vmatprep.subr.mxu0 %v1505_v34  ;;  %v1695_v34 = vld [vmem:[%s2898_s9 + $0xa8] sm:$0xff] }
 0x2b6   : > { %2406 = vpow2.f32 %v1154_v16  ;;  %v1150_v18 = vsub.f32 %v1061_v0, %v1144_v17  ;;  %2245 = vmatpush3.msra.mxu0 %v1489_v35  ;;  %v1694_v35 = vld [vmem:[%s2898_s9 + $0xa0] sm:$0xff] }
 0x2b7   : > { %2246 = vmatprep.subr.mxu0 %v1504_v36  ;;  %v1693_v36 = vld [vmem:[%s2898_s9 + $0x98] sm:$0xff] }
 0x2b8   : > { %v1156_v19 = vmul.f32 1.442695, %v1150_v18 }
 0x2b9   : > { %v1147_v20 = vpop.xlane.xlu1 %1146 }
 0x2ba   : > { %2408 = vpow2.f32 %v1156_v19  ;;  %v1151_v21 = vsub.f32 %v1131_v3, %v1147_v20  ;;  %v850_v19 = vpop.f32.mrf.mxu0 }
 0x2bc   : > { %v1158_v22 = vmul.f32 1.442695, %v1151_v21 }
 0x2be   : > { %2410 = vpow2.f32 %v1158_v22 }
 0x2bf   : > { %v3052_v23 = vpop.eup %2404 }
 0x2c0   : > { %v1160_v24 = vsel %vm1135_vm0, %v3052_v23, 0.0 }
 0x2c1   : > { %1161 = vadd.xlane.f32.xlu0 %v1160_v24 }
 0x2c3   : > { %v3056_v25 = vpop.eup %2406 }
 0x2c4   : > { %v1163_v26 = vsel %vm1135_vm0, %v3056_v25, 0.0 }
 0x2c5   : > { %1164 = vadd.xlane.f32.xlu1 %v1163_v26 }
 0x2c7   : > { %v3060_v27 = vpop.eup %2408 }
 0x2c8   : > { %v1166_v28 = vsel %vm1135_vm0, %v3060_v27, 0.0 }
 0x2c9   : > { %1167 = vadd.xlane.f32.xlu0 %v1166_v28  ;;  %v852_v28 = vpop.f32.mrf.mxu0 }
 0x2cb   : > { %v3064_v29 = vpop.eup %2410 }
 0x2cc   : > { %v1169_v30 = vsel %vm1135_vm0, %v3064_v29, 0.0 }
 0x2cd   : > { %1170 = vadd.xlane.f32.xlu1 %v1169_v30 }
 0x34a   : > { %v1162_v63 = vpop.xlane.xlu0 %1161 }
 0x34b   : > { %2412 = vrcp.f32 %v1162_v63 }
 0x34e   : > { %v1165_v0 = vpop.xlane.xlu1 %1164 }
 0x34f   : > { %2414 = vrcp.f32 %v1165_v0 }
 0x352   : > { %v1168_v1 = vpop.xlane.xlu0 %1167 }
 0x353   : > { %2416 = vrcp.f32 %v1168_v1 }
 0x356   : > { %v1171_v2 = vpop.xlane.xlu1 %1170 }
 0x357   : > { %2418 = vrcp.f32 %v1171_v2 }
 0x358   : > { %v2413_v3 = vpop.eup %2412 }
 0x359   : > { %v1176_v9 = vmul.f32 %v2413_v3, %v1162_v63 }
 0x35b   : > { %v1180_v11 = vsub.f32 2.0, %v1176_v9  ;;  %v1704_v9 = vld [vmem:[%s2898_s9 + $0xf0] sm:$0xff] }
 0x35c   : > { %v2415_v12 = vpop.eup %2414 }
 0x35d   : > { %v1184_v14 = vmul.f32 %v2413_v3, %v1180_v11  ;;  %v1177_v15 = vmul.f32 %v2415_v12, %v1165_v0  ;;  %v1703_v11 = vld [vmem:[%s2898_s9 + $0xe8] sm:$0xff] }
 0x35f   : > { %v1188_v16 = vmul.f32 %v3052_v23, %v1184_v14  ;;  %v1181_v17 = vsub.f32 2.0, %v1177_v15  ;;  %v1699_v14 = vld [vmem:[%s2898_s9 + $0xc8] sm:$0xff] }
 0x360   : > { %v2417_v18 = vpop.eup %2416 }
 0x361   : > { %v1185_v20 = vmul.f32 %v2415_v12, %v1181_v17  ;;  %v1178_v21 = vmul.f32 %v2417_v18, %v1168_v1  ;;  %2204 = vmatmul.mubr.msk.f32.vlgmr.msra.gmra.mxu1 %vm1135_vm0, %v1188_v16  ;;  %v1701_v12 = vld [vmem:[%s2898_s9 + $0xd8] sm:$0xff] }
 0x362   : > { %1300 = vmatpush1.msra.mxu1 %v3068_v33  ;;  %1333 = vmatprep.mubr.f32.mxu1 %v2673_v10 }
 0x363   : > { %v1189_v22 = vmul.f32 %v3056_v25, %v1185_v20  ;;  %v1182_v24 = vsub.f32 2.0, %v1178_v21  ;;  %1373 = vmatprep.subr.mxu1 %v846_v13  ;;  %v1700_v13 = vld [vmem:[%s2898_s9 + $0xd0] sm:$0xff] }
 0x364   : > { %v2419_v26 = vpop.eup %2418 }
 0x365   : > { %v1186_v30 = vmul.f32 %v2417_v18, %v1182_v24  ;;  %v1179_v23 = vmul.f32 %v2419_v26, %v1171_v2  ;;  %2205 = vmatmul.mubr.msk.f32.vlgmr.msra.gmra.mxu1 %vm1135_vm0, %v1189_v22 }
 0x366   : > { %1374 = vmatpush1.msra.mxu1 %v844_v5  ;;  %1407 = vmatprep.mubr.f32.mxu1 %v2673_v10  ;;  %v1705_v5 = vld [vmem:[%s2898_s9 + $0xf8] sm:$0xff] }
 0x367   : > { %v1190_v31 = vmul.f32 %v3060_v27, %v1186_v30  ;;  %v1183_v32 = vsub.f32 2.0, %v1179_v23  ;;  %1447 = vmatprep.subr.mxu1 %v852_v28  ;;  %v1488_v27 = vld [vmem:[%s2896_s12] sm:$0xff] }
 0x368   : > { %2247 = vmatpush3.msra.mxu0 %v1488_v27  ;;  %v1692_v27 = vld [vmem:[%s2898_s9 + $0x90] sm:$0xff] }
 0x369   : > { %v1187_v25 = vmul.f32 %v2419_v26, %v1183_v32  ;;  %2206 = vmatmul.mubr.msk.f32.vlgmr.msra.gmra.mxu1 %vm1135_vm0, %v1190_v31  ;;  %v1698_v31 = vld [vmem:[%s2898_s9 + $0xc0] sm:$0xff] }
 0x36a   : > { %1448 = vmatpush1.msra.mxu1 %v850_v19  ;;  %1481 = vmatprep.mubr.f32.mxu1 %v2673_v10 }
 0x36b   : > { %v1191_v33 = vmul.f32 %v3064_v29, %v1187_v25  ;;  %1718 = vmatprep.subr.mxu1 %v1705_v5  ;;  %v1697_v25 = vld [vmem:[%s2898_s9 + $0xb8] sm:$0xff]  ;;  %v1840_v5 = vld [vmem:[%s2916_s0 + $0xc8] sm:$0xff] }
 0x36d   : > { %2207 = vmatmul.mubr.msk.f32.vlgmr.msra.gmra.mxu1 %vm1135_vm0, %v1191_v33  ;;  %v1696_v33 = vld [vmem:[%s2898_s9 + $0xb0] sm:$0xff] }
 0x36e   : > { %1782 = vmatprep.mubr.f32.mxu1 %v2673_v10  ;;  %1719 = vmatpush1.msra.mxu1 %v1704_v9  ;;  %v1824_v9 = vld [vmem:[%s2916_s0 + $0x48] sm:$0xff] }
 0x36f   : > { %1720 = vmatprep.subr.mxu1 %v1703_v11  ;;  %v1839_v11 = vld [vmem:[%s2916_s0 + $0xc0] sm:$0xff] }
 0x421   : > { %v1261_v37 = vpop.f32.mrf.mxu1 }
 0x423   : > { %v1263_v38 = vpop.f32.mrf.mxu1 }
 0x424   : > { %1588 = vmatprep.mubr.f32.mxu0 %v1263_v38  ;;  %v1690_v38 = vld [vmem:[%s2898_s9 + $0x80] sm:$0xff] }
 0x425   : > { %v1335_v39 = vpop.f32.mrf.mxu1  ;;  %1589 = vmatmul.mubr.f32.vlgmr.msra.gmra.mxu0 %v1261_v37  ;;  %v1691_v37 = vld [vmem:[%s2898_s9 + $0x88] sm:$0xff] }
 0x427   : > { %v1337_v40 = vpop.f32.mrf.mxu1 }
 0x428   : > { %1593 = vmatprep.mubr.f32.mxu0 %v1337_v40  ;;  %v1688_v40 = vld [vmem:[%s2898_s9 + $0x70] sm:$0xff] }
 0x429   : > { %v1409_v29 = vpop.f32.mrf.mxu1  ;;  %1594 = vmatmul.mubr.f32.gmra.mxu0 %v1335_v39  ;;  %v1689_v39 = vld [vmem:[%s2898_s9 + $0x78] sm:$0xff] }
 0x42b   : > { %v1411_v41 = vpop.f32.mrf.mxu1 }
 0x42c   : > { %1598 = vmatprep.mubr.f32.mxu0 %v1411_v41  ;;  %v1686_v41 = vld [vmem:[%s2898_s9 + $0x60] sm:$0xff] }
 0x42d   : > { %v1483_v42 = vpop.f32.mrf.mxu1  ;;  %1599 = vmatmul.mubr.f32.gmra.mxu0 %v1409_v29  ;;  %v1687_v29 = vld [vmem:[%s2898_s9 + $0x68] sm:$0xff] }
 0x42f   : > { %v1485_v43 = vpop.f32.mrf.mxu1 }
 0x430   : > { %1603 = vmatprep.mubr.f32.mxu0 %v1485_v43  ;;  %v1684_v43 = vld [vmem:[%s2898_s9 + $0x50] sm:$0xff] }
 0x431   : > { %1604 = vmatmul.mubr.f32.gmra.mxu0 %v1483_v42  ;;  %v1685_v42 = vld [vmem:[%s2898_s9 + $0x58] sm:$0xff] }
 0x4e5   : > { %v2248_v48 = vpop.f32.mrf.mxu0 }
 0x4e7   : > { %v2249_v50 = vpop.f32.mrf.mxu0 }
 0x4e8   : > { %v2250_v51 = vadd.f32 %v2249_v50, %v2248_v48  ;;  %v1682_v48 = vld [vmem:[%s2898_s9 + $0x40] sm:$0xff]  ;;  %v1680_v50 = vld [vmem:[%s2898_s9 + $0x30] sm:$0xff] }
 0x4e9   : > { %v2251_v52 = vpop.f32.mrf.mxu0 }
 0x4ea   : > { %v1591_v53 = vadd.f32 %v2250_v51, %v1523_v49  ;;  %v1679_v51 = vld [vmem:[%s2898_s9 + $0x28] sm:$0xff] }
 0x4eb   : > { %v2252_v54 = vpop.f32.mrf.mxu0 }
 0x4ec   : > { %v2253_v55 = vadd.f32 %v2252_v54, %v2251_v52  ;;  %v1609_v56 = vadd.f32 %v1591_v53, %v2983_v4  ;;  %v1678_v52 = vld [vmem:[%s2898_s9 + $0x20] sm:$0xff]  ;;  %v1677_v53 = vld [vmem:[%s2898_s9 + $0x18] sm:$0xff]  ;;  %v1676_v54 = vld [vmem:[%s2898_s9 + $0x10] sm:$0xff] }
 0x4ed   : > { %v2254_v57 = vpop.f32.mrf.mxu0 }
 0x4ee   : > { %v1596_v58 = vadd.f32 %v2253_v55, %v1523_v49  ;;  %1613 = vadd.xlane.f32.xlu0 %v1609_v56  ;;  %v1675_v55 = vld [vmem:[%s2898_s9 + $0x8] sm:$0xff] }
 0x4ef   : > { %v2255_v59 = vpop.f32.mrf.mxu0 }
 0x4f0   : > { %v2256_v60 = vadd.f32 %v2255_v59, %v2254_v57  ;;  %v1610_v61 = vadd.f32 %v1596_v58, %v2989_v6  ;;  %v1702_v6 = vld [vmem:[%s2898_s9 + $0xe0] sm:$0xff]  ;;  %v1846_v57 = vld [vmem:[%s2916_s0 + $0xf8] sm:$0xff]  ;;  %v1845_v59 = vld [vmem:[%s2916_s0 + $0xf0] sm:$0xff] }
 0x4f1   : > { %v2257_v62 = vpop.f32.mrf.mxu0  ;;  %1721 = vmatpush1.msra.mxu1 %v1702_v6  ;;  %v1830_v58 = vld [vmem:[%s2916_s0 + $0x78] sm:$0xff]  ;;  %2260 = vmatprep.subr.mxu0 %v1846_v57  ;;  %v1823_v6 = vld [vmem:[%s2916_s0 + $0x40] sm:$0xff]  ;;  %v1817_v57 = vld [vmem:[%s2916_s0 + $0x10] sm:$0xff] }
 0x4f2   : > { %v1601_v63 = vadd.f32 %v2256_v60, %v1523_v49  ;;  %1615 = vadd.xlane.f32.xlu1 %v1610_v61  ;;  %1722 = vmatprep.subr.mxu1 %v1701_v12  ;;  %v1829_v60 = vld [vmem:[%s2916_s0 + $0x70] sm:$0xff]  ;;  %v1838_v12 = vld [vmem:[%s2916_s0 + $0xb8] sm:$0xff] }
 0x4f3   : > { %v2258_v0 = vpop.f32.mrf.mxu0  ;;  %1723 = vmatpush1.msra.mxu1 %v1700_v13  ;;  %2261 = vmatpush3.msra.mxu0 %v1830_v58  ;;  %v1822_v13 = vld [vmem:[%s2916_s0 + $0x38] sm:$0xff]  ;;  %v1832_v58 = vld [vmem:[%s2916_s0 + $0x88] sm:$0xff] }
 0x4f4   : > { %v2259_v1 = vadd.f32 %v2258_v0, %v2257_v62  ;;  %v1611_v4 = vadd.f32 %v1601_v63, %v2995_v7  ;;  %1724 = vmatprep.subr.mxu1 %v1699_v14  ;;  %2262 = vmatprep.subr.mxu0 %v1845_v59  ;;  %v1828_v62 = vld [vmem:[%s2916_s0 + $0x68] sm:$0xff]  ;;  %v1843_v63 = vld [vmem:[%s2916_s0 + $0xe0] sm:$0xff]  ;;  %v1837_v14 = vld [vmem:[%s2916_s0 + $0xb0] sm:$0xff] }
 0x4f5   : > { %1725 = vmatpush1.msra.mxu1 %v1698_v31  ;;  %2263 = vmatpush3.msra.mxu0 %v1829_v60  ;;  %v1827_v0 = vld [vmem:[%s2916_s0 + $0x60] sm:$0xff] }
 0x4f6   : > { %v1606_v2 = vadd.f32 %v2259_v1, %v1523_v49  ;;  %1617 = vadd.xlane.f32.xlu0 %v1611_v4  ;;  %1726 = vmatprep.subr.mxu1 %v1697_v25  ;;  %v1681_v49 = vld [vmem:[%s2898_s9 + $0x38] sm:$0xff]  ;;  %v1831_v59 = vld [vmem:[%s2916_s0 + $0x80] sm:$0xff] }
 0x4f7   : > { %1727 = vmatpush1.msra.mxu1 %v1696_v33  ;;  %v1842_v1 = vld [vmem:[%s2916_s0 + $0xd8] sm:$0xff]  ;;  %v1815_v60 = vld [vmem:[%s2916_s0] sm:$0xff] }
 0x4f8   : > { %v1612_v3 = vadd.f32 %v1606_v2, %v3001_v8  ;;  %1728 = vmatprep.subr.mxu1 %v1695_v34  ;;  %v1841_v2 = vld [vmem:[%s2916_s0 + $0xd0] sm:$0xff] }
 0x4f9   : > { %1729 = vmatpush1.msra.mxu1 %v1694_v35  ;;  %v1660_v35 = vsub.s32 2, %v3115_v45 }
 0x4fa   : > { %1619 = vadd.xlane.f32.xlu1 %v1612_v3  ;;  %1730 = vmatprep.subr.mxu1 %v1693_v36 }
 0x4fb   : > { %1731 = vmatpush1.msra.mxu1 %v1692_v27  ;;  %v1668_v27 = vsub.s32 3, %v3115_v45 }
 0x4fc   : > { %1732 = vmatprep.subr.mxu1 %v1691_v37  ;;  %v1661_v37 = vrot.slane %v3119_v47, %v1660_v35 }
 0x4fd   : > { %1733 = vmatpush1.msra.mxu1 %v1690_v38 }
 0x4fe   : > { %1734 = vmatprep.subr.mxu1 %v1689_v39 }
 0x4ff   : > { %1735 = vmatpush1.msra.mxu1 %v1688_v40  ;;  %v1669_v40 = vrot.slane %v3119_v47, %v1668_v27 }
 0x500   : > { %1736 = vmatprep.subr.mxu1 %v1687_v29 }
 0x501   : > { %1737 = vmatpush1.msra.mxu1 %v1686_v41 }
 0x502   : > { %1738 = vmatprep.subr.mxu1 %v1685_v42 }
 0x503   : > { %1739 = vmatpush1.msra.mxu1 %v1684_v43 }
 0x504   : > { %1740 = vmatprep.subr.mxu1 %v1683_v44 }
 0x505   : > { %1741 = vmatpush1.msra.mxu1 %v1682_v48 }
 0x506   : > { %1742 = vmatprep.subr.mxu1 %v1681_v49 }
 0x507   : > { %1743 = vmatpush1.msra.mxu1 %v1680_v50 }
 0x508   : > { %1744 = vmatprep.subr.mxu1 %v1679_v51 }
 0x509   : > { %1745 = vmatpush1.msra.mxu1 %v1678_v52 }
 0x50a   : > { %1746 = vmatprep.subr.mxu1 %v1677_v53 }
 0x50b   : > { %1747 = vmatpush1.msra.mxu1 %v1676_v54 }
 0x50c   : > { %1748 = vmatprep.subr.mxu1 %v1675_v55  ;;  %v1818_v55 = vld [vmem:[%s2916_s0 + $0x18] sm:$0xff] }
 0x577   : > { %v1614_v7 = vpop.xlane.xlu0 %1613 }
 0x578   : > { %v1622_v15 = vmul.f32 0.0078125, %v1614_v7  ;;  %v1821_v7 = vld [vmem:[%s2916_s0 + $0x30] sm:$0xff] }
 0x57a   : > { %v3135_v16 = vsub.f32 %v1609_v56, %v1622_v15  ;;  %v1674_v56 = vld [vmem:[%s2898_s9] sm:$0xff]  ;;  %v1836_v15 = vld [vmem:[%s2916_s0 + $0xa8] sm:$0xff] }
 0x57b   : > { %v1616_v8 = vpop.xlane.xlu1 %1615  ;;  %1749 = vmatpush1.msra.mxu1 %v1674_v56  ;;  %v1833_v56 = vld [vmem:[%s2916_s0 + $0x90] sm:$0xff] }
 0x57c   : > { %v1623_v17 = vmul.f32 0.0078125, %v1616_v8  ;;  %v1630_v18 = vmul.f32 %v3135_v16, %v3135_v16  ;;  %v1820_v8 = vld [vmem:[%s2916_s0 + $0x28] sm:$0xff] }
 0x57e   : > { %v3139_v19 = vsub.f32 %v1610_v61, %v1623_v17  ;;  %1634 = vadd.xlane.f32.xlu0 %v1630_v18  ;;  %v1844_v61 = vld [vmem:[%s2916_s0 + $0xe8] sm:$0xff]  ;;  %v1835_v17 = vld [vmem:[%s2916_s0 + $0xa0] sm:$0xff] }
 0x57f   : > { %v1618_v20 = vpop.xlane.xlu0 %1617  ;;  %2264 = vmatprep.subr.mxu0 %v1844_v61  ;;  %v1819_v18 = vld [vmem:[%s2916_s0 + $0x20] sm:$0xff]  ;;  %v1714_v61 = vsub.s32 1, %v3115_v45 }
 0x580   : > { %v1624_v21 = vmul.f32 0.0078125, %v1618_v20  ;;  %v1631_v22 = vmul.f32 %v3139_v19, %v3139_v19  ;;  %2265 = vmatpush3.msra.mxu0 %v1828_v62 }
 0x581   : > { %2266 = vmatprep.subr.mxu0 %v1843_v63 }
 0x582   : > { %v3143_v24 = vsub.f32 %v1611_v4, %v1624_v21  ;;  %1636 = vadd.xlane.f32.xlu1 %v1631_v22  ;;  %v1826_v4 = vld [vmem:[%s2916_s0 + $0x58] sm:$0xff]  ;;  %2267 = vmatpush3.msra.mxu0 %v1827_v0 }
 0x583   : > { %v1620_v26 = vpop.xlane.xlu1 %1619  ;;  %2268 = vmatprep.subr.mxu0 %v1842_v1 }
 0x584   : > { %v1625_v28 = vmul.f32 0.0078125, %v1620_v26  ;;  %v1632_v30 = vmul.f32 %v3143_v24, %v3143_v24  ;;  %2269 = vmatpush3.msra.mxu0 %v1826_v4 }
 0x585   : > { %2270 = vmatprep.subr.mxu0 %v1841_v2 }
 0x586   : > { %v3147_v23 = vsub.f32 %v1612_v3, %v1625_v28  ;;  %1638 = vadd.xlane.f32.xlu0 %v1632_v30  ;;  %v1825_v3 = vld [vmem:[%s2916_s0 + $0x50] sm:$0xff] }
 0x587   : > { %2271 = vmatpush3.msra.mxu0 %v1825_v3 }
 0x588   : > { %v1633_v32 = vmul.f32 %v3147_v23, %v3147_v23  ;;  %2272 = vmatprep.subr.mxu0 %v1840_v5 }
 0x589   : > { %2273 = vmatpush3.msra.mxu0 %v1824_v9 }
 0x58a   : > { %1640 = vadd.xlane.f32.xlu1 %v1633_v32  ;;  %2274 = vmatprep.subr.mxu0 %v1839_v11 }
 0x58b   : > { %2275 = vmatpush3.msra.mxu0 %v1823_v6 }
 0x58c   : > { %2276 = vmatprep.subr.mxu0 %v1838_v12 }
 0x58d   : > { %2277 = vmatpush3.msra.mxu0 %v1822_v13 }
 0x58e   : > { %2278 = vmatprep.subr.mxu0 %v1837_v14 }
 0x58f   : > { %2279 = vmatpush3.msra.mxu0 %v1821_v7 }
 0x590   : > { %2280 = vmatprep.subr.mxu0 %v1836_v15 }
 0x591   : > { %2281 = vmatpush3.msra.mxu0 %v1820_v8 }
 0x592   : > { %2282 = vmatprep.subr.mxu0 %v1835_v17 }
 0x593   : > { %2283 = vmatpush3.msra.mxu0 %v1819_v18 }
 0x607   : > { %v1635_v20 = vpop.xlane.xlu0 %1634 }
 0x608   : > { %v1642_v21 = vmul.f32 0.0078125, %v1635_v20 }
 0x60a   : > { %v1646_v22 = vadd.f32 1e-05, %v1642_v21 }
 0x60b   : > { %v1637_v26 = vpop.xlane.xlu1 %1636 }
 0x60c   : > { %2420 = vrsqrt.f32 %v1646_v22  ;;  %v1643_v28 = vmul.f32 0.0078125, %v1637_v26 }
 0x60e   : > { %v1647_v30 = vadd.f32 1e-05, %v1643_v28 }
 0x60f   : > { %v1639_v31 = vpop.xlane.xlu0 %1638 }
 0x610   : > { %2422 = vrsqrt.f32 %v1647_v30  ;;  %v1644_v32 = vmul.f32 0.0078125, %v1639_v31 }
 0x612   : > { %v1648_v25 = vadd.f32 1e-05, %v1644_v32  ;;  %v1850_v32 = vrot.slane %v3119_v47, %v1714_v61 }
 0x613   : > { %v1641_v33 = vpop.xlane.xlu1 %1640 }
 0x614   : > { %2424 = vrsqrt.f32 %v1648_v25  ;;  %v1645_v34 = vmul.f32 0.0078125, %v1641_v33 }
 0x616   : > { %v1649_v36 = vadd.f32 1e-05, %v1645_v34 }
 0x618   : > { %2426 = vrsqrt.f32 %v1649_v36 }
 0x619   : > { %v2421_v38 = vpop.eup %2420 }
 0x61a   : > { %v1654_v39 = vmul.f32 %v2421_v38, %v3135_v16 }
 0x61c   : > { %v1662_v29 = vmul.f32 %v1661_v37, %v1654_v39 }
 0x61d   : > { %v2423_v41 = vpop.eup %2422 }
 0x61e   : > { %v1670_v42 = vadd.f32 %v1669_v40, %v1662_v29  ;;  %v1655_v43 = vmul.f32 %v2423_v41, %v3139_v19 }
 0x620   : > { %1783 = vmatmul.mubr.f32.vlgmr.msra.gmra.mxu1 %v1670_v42  ;;  %v1663_v44 = vmul.f32 %v1661_v37, %v1655_v43 }
 0x621   : > { %v2425_v48 = vpop.eup %2424  ;;  %1788 = vmatprep.mubr.f32.mxu1 %v2673_v10 }
 0x622   : > { %v1671_v49 = vadd.f32 %v1669_v40, %v1663_v44  ;;  %v1656_v50 = vmul.f32 %v2425_v48, %v3143_v24  ;;  %v1834_v24 = vld [vmem:[%s2916_s0 + $0x98] sm:$0xff] }
 0x623   : > { %2284 = vmatprep.subr.mxu0 %v1834_v24 }
 0x624   : > { %1789 = vmatmul.mubr.f32.gmra.mxu1 %v1671_v49  ;;  %v1664_v16 = vmul.f32 %v1661_v37, %v1656_v50  ;;  %2285 = vmatpush3.msra.mxu0 %v1818_v55 }
 0x625   : > { %v2427_v51 = vpop.eup %2426  ;;  %1794 = vmatprep.mubr.f32.mxu1 %v2673_v10  ;;  %2286 = vmatprep.subr.mxu0 %v1833_v56 }
 0x626   : > { %v1672_v52 = vadd.f32 %v1669_v40, %v1664_v16  ;;  %v1657_v19 = vmul.f32 %v2427_v51, %v3147_v23  ;;  %2287 = vmatpush3.msra.mxu0 %v1817_v57  ;;  %v1816_v23 = vld [vmem:[%s2916_s0 + $0x8] sm:$0xff] }
 0x627   : > { %2288 = vmatprep.subr.mxu0 %v1832_v58 }
 0x628   : > { %1795 = vmatmul.mubr.f32.gmra.mxu1 %v1672_v52  ;;  %v1665_v53 = vmul.f32 %v1661_v37, %v1657_v19  ;;  %2289 = vmatpush3.msra.mxu0 %v1816_v23 }
 0x629   : > { %1800 = vmatprep.mubr.f32.mxu1 %v2673_v10  ;;  %2290 = vmatprep.subr.mxu0 %v1831_v59  ;;  %v1706_v10 = vld [vmem:[%s2909_s30] sm:$0x3] }
 0x62a   : > { %v1673_v54 = vadd.f32 %v1669_v40, %v1665_v53  ;;  %2291 = vmatpush3.msra.mxu0 %v1815_v60  ;;  %v1711_v62 = vrot.slane %v1706_v10, %v1522_v46  ;;  %v1715_v63 = vrot.slane %v1706_v10, %v1714_v61 }
 0x62c   : > { %1801 = vmatmul.mubr.f32.gmra.mxu1 %v1673_v54 }
 0x6e0   : > { %v1784_v0 = vpop.f32.mrf.mxu1 }
 0x6e1   : > { %v1785_v1 = vadd.f32 %v1784_v0, %v1711_v62 }
 0x6e2   : > { %v1786_v4 = vpop.f32.mrf.mxu1 }
 0x6e3   : > { %v1787_v2 = vadd.f32 %v1786_v4, %v1715_v63  ;;  %v1807_v9 = vmax.f32 %v1785_v1, 0.0 }
 0x6e4   : > { %v1790_v3 = vpop.f32.mrf.mxu1 }
 0x6e5   : > { %v1808_v5 = vmax.f32 %v1787_v2, 0.0  ;;  %v1791_v11 = vadd.f32 %v1790_v3, %v1711_v62 }
 0x6e6   : > { %v1792_v6 = vpop.f32.mrf.mxu1 }
 0x6e7   : > { %v1793_v12 = vadd.f32 %v1792_v6, %v1715_v63  ;;  %1915 = vmatprep.mubr.f32.mxu0 %v1808_v5  ;;  %v1809_v7 = vmax.f32 %v1791_v11, 0.0  ;;  %v1982_v5 = vsub.s32 4, %v3115_v45  ;;  %v1990_v11 = vsub.s32 5, %v3115_v45 }
 0x6e8   : > { %v1796_v13 = vpop.f32.mrf.mxu1  ;;  %1916 = vmatmul.mubr.f32.vlgmr.msra.gmra.mxu0 %v1807_v9 }
 0x6e9   : > { %v1810_v14 = vmax.f32 %v1793_v12, 0.0  ;;  %v1797_v15 = vadd.f32 %v1796_v13, %v1711_v62  ;;  %v1983_v12 = vrot.slane %v3119_v47, %v1982_v5 }
 0x6ea   : > { %v1798_v8 = vpop.f32.mrf.mxu1 }
 0x6eb   : > { %v1799_v17 = vadd.f32 %v1798_v8, %v1715_v63  ;;  %1920 = vmatprep.mubr.f32.mxu0 %v1810_v14  ;;  %v1811_v20 = vmax.f32 %v1797_v15, 0.0  ;;  %v1991_v14 = vrot.slane %v3119_v47, %v1990_v11 }
 0x6ec   : > { %v1802_v46 = vpop.f32.mrf.mxu1  ;;  %1921 = vmatmul.mubr.f32.gmra.mxu0 %v1809_v7 }
 0x6ed   : > { %v1812_v18 = vmax.f32 %v1799_v17, 0.0  ;;  %v1803_v21 = vadd.f32 %v1802_v46, %v1711_v62 }
 0x6ee   : > { %v1804_v22 = vpop.f32.mrf.mxu1 }
 0x6ef   : > { %v1805_v26 = vadd.f32 %v1804_v22, %v1715_v63  ;;  %1925 = vmatprep.mubr.f32.mxu0 %v1812_v18  ;;  %v1813_v30 = vmax.f32 %v1803_v21, 0.0 }
 0x6f0   : > { %1926 = vmatmul.mubr.f32.gmra.mxu0 %v1811_v20 }
 0x6f1   : > { %v1814_v28 = vmax.f32 %v1805_v26, 0.0 }
 0x6f3   : > { %1930 = vmatprep.mubr.f32.mxu0 %v1814_v28 }
 0x6f4   : > { %1931 = vmatmul.mubr.f32.gmra.mxu0 %v1813_v30 }
 0x7a8   : > { %v2292_v31 = vpop.f32.mrf.mxu0 }
 0x7aa   : > { %v2293_v25 = vpop.f32.mrf.mxu0 }
 0x7ab   : > { %v2294_v33 = vadd.f32 %v2293_v25, %v2292_v31 }
 0x7ac   : > { %v2295_v34 = vpop.f32.mrf.mxu0 }
 0x7ad   : > { %v1918_v35 = vadd.f32 %v2294_v33, %v1850_v32 }
 0x7ae   : > { %v2296_v36 = vpop.f32.mrf.mxu0 }
 0x7af   : > { %v2297_v27 = vadd.f32 %v2296_v36, %v2295_v34  ;;  %1936 = vadd.xlane.f32.xlu0 %v1918_v35 }
 0x7b0   : > { %v2298_v37 = vpop.f32.mrf.mxu0 }
 0x7b1   : > { %v1923_v38 = vadd.f32 %v2297_v27, %v1850_v32 }
 0x7b2   : > { %v2299_v39 = vpop.f32.mrf.mxu0 }
 0x7b3   : > { %v2300_v40 = vadd.f32 %v2299_v39, %v2298_v37  ;;  %1938 = vadd.xlane.f32.xlu1 %v1923_v38 }
 0x7b4   : > { %v2301_v29 = vpop.f32.mrf.mxu0 }
 0x7b5   : > { %v1928_v41 = vadd.f32 %v2300_v40, %v1850_v32 }
 0x7b6   : > { %v2302_v42 = vpop.f32.mrf.mxu0 }
 0x7b7   : > { %v2303_v43 = vadd.f32 %v2302_v42, %v2301_v29  ;;  %1940 = vadd.xlane.f32.xlu0 %v1928_v41 }
 0x7b9   : > { %v1933_v44 = vadd.f32 %v2303_v43, %v1850_v32 }
 0x7bb   : > { %1942 = vadd.xlane.f32.xlu1 %v1933_v44 }
 0x838   : > { %v1937_v48 = vpop.xlane.xlu0 %1936 }
 0x839   : > { %v1944_v49 = vmul.f32 0.0078125, %v1937_v48 }
 0x83b   : > { %v1948_v50 = vsub.f32 %v1918_v35, %v1944_v49 }
 0x83c   : > { %v1939_v16 = vpop.xlane.xlu1 %1938 }
 0x83d   : > { %v1945_v51 = vmul.f32 0.0078125, %v1939_v16  ;;  %v1952_v52 = vmul.f32 %v1948_v50, %v1948_v50 }
 0x83f   : > { %v1949_v19 = vsub.f32 %v1923_v38, %v1945_v51  ;;  %1956 = vadd.xlane.f32.xlu0 %v1952_v52 }
 0x840   : > { %v1941_v53 = vpop.xlane.xlu0 %1940 }
 0x841   : > { %v1946_v54 = vmul.f32 0.0078125, %v1941_v53  ;;  %v1953_v24 = vmul.f32 %v1949_v19, %v1949_v19 }
 0x843   : > { %v1950_v55 = vsub.f32 %v1928_v41, %v1946_v54  ;;  %1958 = vadd.xlane.f32.xlu1 %v1953_v24 }
 0x844   : > { %v1943_v56 = vpop.xlane.xlu1 %1942 }
 0x845   : > { %v1947_v57 = vmul.f32 0.0078125, %v1943_v56  ;;  %v1954_v58 = vmul.f32 %v1950_v55, %v1950_v55 }
 0x847   : > { %v1951_v23 = vsub.f32 %v1933_v44, %v1947_v57  ;;  %1960 = vadd.xlane.f32.xlu0 %v1954_v58 }
 0x849   : > { %v1955_v59 = vmul.f32 %v1951_v23, %v1951_v23 }
 0x84b   : > { %1962 = vadd.xlane.f32.xlu1 %v1955_v59 }
 0x8c8   : > { %v1957_v60 = vpop.xlane.xlu0 %1956 }
 0x8c9   : > { %v1964_v10 = vmul.f32 0.0078125, %v1957_v60 }
 0x8cb   : > { %v1968_v61 = vadd.f32 1e-05, %v1964_v10 }
 0x8cc   : > { %v1959_v62 = vpop.xlane.xlu1 %1958 }
 0x8cd   : > { %2428 = vrsqrt.f32 %v1968_v61  ;;  %v1965_v63 = vmul.f32 0.0078125, %v1959_v62 }
 0x8cf   : > { %v1969_v0 = vadd.f32 1e-05, %v1965_v63 }
 0x8d0   : > { %v1961_v1 = vpop.xlane.xlu0 %1960 }
 0x8d1   : > { %2430 = vrsqrt.f32 %v1969_v0  ;;  %v1966_v4 = vmul.f32 0.0078125, %v1961_v1 }
 0x8d3   : > { %v1970_v2 = vadd.f32 1e-05, %v1966_v4 }
 0x8d4   : > { %v1963_v3 = vpop.xlane.xlu1 %1962 }
 0x8d5   : > { %2432 = vrsqrt.f32 %v1970_v2  ;;  %v1967_v9 = vmul.f32 0.0078125, %v1963_v3 }
 0x8d7   : > { %v1971_v6 = vadd.f32 1e-05, %v1967_v9 }
 0x8d9   : > { %2434 = vrsqrt.f32 %v1971_v6 }
 0x8da   : > { %v2429_v13 = vpop.eup %2428 }
 0x8db   : > { %v1976_v7 = vmul.f32 %v2429_v13, %v1948_v50 }
 0x8dd   : > { %v1984_v15 = vmul.f32 %v1983_v12, %v1976_v7 }
 0x8de   : > { %v2431_v8 = vpop.eup %2430 }
 0x8df   : > { %v1992_v17 = vadd.f32 %v1991_v14, %v1984_v15  ;;  %v1977_v46 = vmul.f32 %v2431_v8, %v1949_v19 }
 0x8e1   : > { %1996 = vst [vmem:[#allocation2 + $0x10] sm:$0xff] %v1992_v17  ;;  %v1985_v18 = vmul.f32 %v1983_v12, %v1977_v46 }
 0x8e2   : > { %v2433_v20 = vpop.eup %2432 }
 0x8e3   : > { %v1993_v21 = vadd.f32 %v1991_v14, %v1985_v18  ;;  %v1978_v22 = vmul.f32 %v2433_v20, %v1950_v55 }
 0x8e5   : > { %1997 = vst [vmem:[#allocation2] sm:$0xff] %v1993_v21  ;;  %v1986_v26 = vmul.f32 %v1983_v12, %v1978_v22 }
 0x8e6   : > { %v2435_v45 = vpop.eup %2434 }
 0x8e7   : > { %v1994_v28 = vadd.f32 %v1991_v14, %v1986_v26  ;;  %v1979_v30 = vmul.f32 %v2435_v45, %v1951_v23 }
 0x8e9   : > { %1998 = vst [vmem:[#allocation2 + $0x18] sm:$0xff] %v1994_v28  ;;  %v1987_v31 = vmul.f32 %v1983_v12, %v1979_v30  ;;  %2003 = sbr.rel (%p2208_p11) target bundleno = 2288 (0x8f0), region = 76 }
 0x8eb   : > { %v1995_v32 = vadd.f32 %v1991_v14, %v1987_v31 }
 0x8ed   : > { %1999 = vst [vmem:[#allocation2 + $0x8] sm:$0xff] %v1995_v32 }
 0x8ee   : > { %2004 = vst [vmem:[#allocation12] sm:$0xff] %v1992_v17  ;;  %2005 = vst [vmem:[#allocation12 + $0x8] sm:$0xff] %v1993_v21 }
 0x8ef   : > { %2006 = vst [vmem:[#allocation12 + $0x10] sm:$0xff] %v1994_v28  ;;  %2007 = vst [vmem:[#allocation12 + $0x18] sm:$0xff] %v1995_v32 }
 0x8f0 PF: > { %p2343_p0 = scmp.eq.s32.totalorder %s2803_s16, 1  ;;  %s2674_s1 = smov [#allocation12]  }
 0x8f1   : > { %s2017_s18 = sshll.u32 %s2674_s1, 4  ;;  %s2018_s18 = int_to_ptr.vmem [resolvable:$true] %s2017_s18 }
 0x8f2   : > { %s2574_s8 = scalar_lea.vmem %s2018_s18, 512  ;;  %p2581_p3 = scmp.lt.s32.totalorder %s2018_s18, %s2018_s18 }
 0x8f3   : > { %p2575_p1 = scmp.ne.s32.totalorder %s2018_s18, %s2574_s8  ;;  %p2582_p2 = scmp.lt.s32.totalorder %s2574_s8, %s2574_s8 }
 0x8f5   : > { %p2576_p12 = pnand %p2575_p1, %p2343_p0  ;;  %p2583_p4 = por %p2582_p2, %p2581_p3 }
 0x8f7   : > { %p2577_p13 = pneg %p2576_p12 }
 0x8f9   : > { %p2584_p5 = pnand %p2583_p4, %p2577_p13 }
 0x8fb   : > { %2587 = shalt.err (!%p2584_p5)
}
 0x8fc   : > { %s2675_s27 = smov 128   ;;  %s2676_s20 = smov 8  }
 0x8fd   : > { %2320 = dma.vmem_to_hbm [thread:$0]  (%p2343_p0), %s2018_s18, 512, %s3266_s7, [#allocation5], %s2675_s27, %s2675_s27, %s2676_s20  }
 0x8fe   : > { %2635 = dma.done.wait (%p2343_p0), [#allocation5], 512  }
 0x8ff   : > { %2637 = vsyncadd (%p2343_p0), [#allocation5], 4294966784 }
 0x900 PF: > { %s25_s29 = sadd.s32 1, %s2660_s29   ;;  %s3281_s12 = sld [smem:[#allocation17_spill]] }
 0x901   : > { %p22_p8 = scmp.ge.s32.totalorder %s25_s29, 4   ;;  %s3282_s24 = smov %s2644_s25 }
 0x902   : > { %s3283_s25 = smov %s2648_s26  ;;  %s3284_s26 = smov %s2761_s13 }
 0x903   : > { %s3285_s27 = smov %s2656_s28  ;;  %24 = sbr.rel (!%p22_p8) target bundleno = 12 (0xc), region = 141 }
 0x906   : > { %s3286_s28 = smov %s3281_s12 }
 0x908   :  { %2033 = vsyncpa [#allocation4], 1 }
 0x909   :  { %2035 = vsyncpa [#allocation4 + $0x1], 1 }
 0x90a   :  { %2036 = vsyncpa [#allocation7], 1 }
 0x90b   :  { %2038 = vsyncpa [#allocation7 + $0x1], 1 }
 0x90c   :  { %2039 = vsyncpa [#allocation10], 1 }
 0x90d   :  { %2041 = vsyncpa [#allocation10 + $0x1], 1 }
 0x90e   :  { %2042 = vsyncpa [#allocation5], 1 }
 0x90f   :  { %2044 = vsyncpa [#allocation5 + $0x1], 1 }

</bundles_post_ra>
